<compile_context>
chip_gen: v6e
topology: v6e:2x2x1
jax: 0.10.0
libtpu: 0.0.40
codegen_flags: <defaults>
</compile_context>

<pallas_src>
import jax
import jax.numpy as jnp
from jax.experimental import pallas as pl
from jax.experimental.pallas import tpu as pltpu


def _lstm_cell(c, gates, H):
    """One LSTM cell update. gates: (Bt, 4H) f32 pre-activations, PyTorch order i,f,g,o."""
    # Whole-vreg activations over the full 4H=128-lane gate block:
    #   sigmoid(x) == 0.5*tanh(0.5*x) + 0.5  (one EUP pass + two cheap VPU ops),
    # then static lane slices to pick the per-gate groups.
    sg = 0.5 * jnp.tanh(0.5 * gates) + 0.5
    tg = jnp.tanh(gates)
    i = sg[:, 0 * H:1 * H]
    f = sg[:, 1 * H:2 * H]
    g = tg[:, 2 * H:3 * H]
    o = sg[:, 3 * H:4 * H]
    c_new = f * c + i * g
    h_new = o * jnp.tanh(c_new)
    return h_new, c_new


def lstm_predictor_kernel(xg0_ref,    # (T, B_TILE, 4H) f32: precomputed x@Wih0 + b0, time-major
                          whh0_ref,   # (H, 4H)  bf16
                          wih1_ref,   # (H, 4H)  bf16
                          whh1_ref,   # (H, 4H)  bf16
                          b1_ref,     # (1, 4H)  f32:  b_ih_l1 + b_hh_l1
                          wlin_ref,   # (H, O_pad) f32
                          blin_ref,   # (1, O_pad) f32
                          o_ref):     # (B_TILE, O_pad) f32
    T = xg0_ref.shape[0]
    Bt = xg0_ref.shape[1]
    H = whh0_ref.shape[0]

    whh0 = whh0_ref[...]
    wih1 = wih1_ref[...]
    whh1 = whh1_ref[...]
    b1 = b1_ref[...]

    h0 = jnp.zeros((Bt, H), jnp.float32)
    c0 = jnp.zeros((Bt, H), jnp.float32)
    h1 = jnp.zeros((Bt, H), jnp.float32)
    c1 = jnp.zeros((Bt, H), jnp.float32)

    # Fully unrolled recurrence: T is static and small, per-step compute is tiny, so
    # unrolling lets the scheduler overlap MXU / EUP / VPU work across steps.
    for t in range(T):
        # Layer-1 recurrent dot depends only on the PREVIOUS step's h1 -> issue it before
        # layer-0's cell update so it overlaps with the layer-0 critical path.
        g1_rec = jnp.dot(h1.astype(jnp.bfloat16), whh1,
                         preferred_element_type=jnp.float32)

        # Layer 0: input contribution precomputed outside; one recurrent dot per step.
        g0 = xg0_ref[t] + jnp.dot(h0.astype(jnp.bfloat16), whh0,
                                  preferred_element_type=jnp.float32)
        h0, c0 = _lstm_cell(c0, g0, H)

        # Layer 1: second dot only needs the freshly computed h0 (no per-step concat).
        g1 = g1_rec + jnp.dot(h0.astype(jnp.bfloat16), wih1,
                              preferred_element_type=jnp.float32) + b1
        h1, c1 = _lstm_cell(c1, g1, H)

    # Linear on the last timestep's top-layer hidden state (lane-dense padded output).
    # Kept fully f32: single dot off the serial per-step path, preserves output accuracy.
    out = jnp.dot(h1, wlin_ref[...], preferred_element_type=jnp.float32) + blin_ref[...]
    o_ref[...] = out.astype(o_ref.dtype)


def init_params(key, latent_space, hidden_size, output_size):
    """Deterministic PyTorch-style uniform(-1/sqrt(H), 1/sqrt(H)) init."""
    bound = 1.0 / jnp.sqrt(jnp.float32(hidden_size))
    keys = jax.random.split(key, 10)

    def u(k, shape):
        return jax.random.uniform(k, shape, jnp.float32, -bound, bound)

    H, L, O = hidden_size, latent_space, output_size
    return dict(
        w_ih_l0=u(keys[0], (4 * H, L)), w_hh_l0=u(keys[1], (4 * H, H)),
        b_ih_l0=u(keys[2], (4 * H,)),   b_hh_l0=u(keys[3], (4 * H,)),
        w_ih_l1=u(keys[4], (4 * H, H)), w_hh_l1=u(keys[5], (4 * H, H)),
        b_ih_l1=u(keys[6], (4 * H,)),   b_hh_l1=u(keys[7], (4 * H,)),
        w_lin=u(keys[8], (O, H)),       b_lin=u(keys[9], (O,)),
    )


@jax.jit
def lstm_predictor_forward(input_, actions, params):
    # ---- PyTorch-forward glue (plain JAX) ----
    if input_.ndim > 3:
        input_ = input_.reshape(input_.shape[0], input_.shape[1], -1)   # flatten(2)
    if actions.ndim < 3:
        actions = actions[None, ...]                                    # unsqueeze(0)
    lstm_input = jnp.concatenate([input_, actions], axis=-1).astype(jnp.float32)  # (B, T, L)
    B, T, L = lstm_input.shape
    H = params["w_hh_l0"].shape[1]
    O = params["w_lin"].shape[0]

    # Pad batch to a multiple of the per-core batch tile; pad output lanes to 128.
    B_TILE = 8
    Bp = max(B_TILE, ((B + B_TILE - 1) // B_TILE) * B_TILE)
    O_pad = max(128, ((O + 127) // 128) * 128)
    x_pad = jnp.pad(lstm_input, ((0, Bp - B), (0, 0), (0, 0)))          # (Bp, T, L)
    x_tm = jnp.transpose(x_pad, (1, 0, 2))                              # (T, Bp, L)

    # Weight prep (pre-transposed so the kernel does plain x @ W on the MXU).
    wih0 = params["w_ih_l0"].T                                          # (L, 4H)  f32
    b0 = (params["b_ih_l0"] + params["b_hh_l0"])[None, :]               # (1, 4H)  f32
    # Recurrent weights in bf16 (MXU-native operands, f32 accumulation in-kernel).
    whh0 = params["w_hh_l0"].T.astype(jnp.bfloat16)                     # (H, 4H)
    wih1 = params["w_ih_l1"].T.astype(jnp.bfloat16)                     # (H, 4H)
    whh1 = params["w_hh_l1"].T.astype(jnp.bfloat16)                     # (H, 4H)
    b1 = (params["b_ih_l1"] + params["b_hh_l1"])[None, :]               # (1, 4H)  f32
    wlin = jnp.pad(params["w_lin"].T, ((0, 0), (0, O_pad - O)))         # (H, O_pad) f32
    blin = jnp.pad(params["b_lin"], (0, O_pad - O))[None, :]            # (1, O_pad) f32

    # Hoisted layer-0 input projection (big parallel matmul -> XLA), bias folded in, f32.
    xg0 = (jnp.dot(x_tm.reshape(T * Bp, L), wih0,
                   preferred_element_type=jnp.float32) + b0).reshape(T, Bp, 4 * H)

    # Advisory cost estimate for the serial recurrence kernel (3 dots/step + final linear).
    flops = 2 * T * 3 * Bp * H * 4 * H + 2 * Bp * H * O_pad
    transcendentals = T * 2 * (2 * Bp * 4 * H + Bp * H)
    bytes_accessed = (4 * xg0.size
                      + 2 * (whh0.size + wih1.size + whh1.size)
                      + 4 * (b1.size + wlin.size + blin.size + Bp * O_pad))

    # ---- hot path: full 2-layer LSTM recurrence + final linear in one Pallas kernel ----
    # Batch-parallel grid axis: no-op at Bp=8, but splits real batches across v7x's two
    # TensorCores and bounds per-core xg0 VMEM residency.
    out_pad = pl.pallas_call(
        lstm_predictor_kernel,
        out_shape=jax.ShapeDtypeStruct((Bp, O_pad), jnp.float32),
        grid=(Bp // B_TILE,),
        in_specs=[
            pl.BlockSpec((T, B_TILE, 4 * H), lambda b: (0, b, 0)),   # xg0
            pl.BlockSpec((H, 4 * H), lambda b: (0, 0)),              # whh0
            pl.BlockSpec((H, 4 * H), lambda b: (0, 0)),              # wih1
            pl.BlockSpec((H, 4 * H), lambda b: (0, 0)),              # whh1
            pl.BlockSpec((1, 4 * H), lambda b: (0, 0)),              # b1
            pl.BlockSpec((H, O_pad), lambda b: (0, 0)),              # wlin
            pl.BlockSpec((1, O_pad), lambda b: (0, 0)),              # blin
        ],
        out_specs=pl.BlockSpec((B_TILE, O_pad), lambda b: (b, 0)),
        compiler_params=pltpu.CompilerParams(
            dimension_semantics=("parallel",)),
        cost_estimate=pl.CostEstimate(flops=flops,
                                      transcendentals=transcendentals,
                                      bytes_accessed=bytes_accessed),
    )(xg0, whh0, wih1, whh1, b1, wlin, blin)

    # Unpad + restore (B, 1, O) to match the PyTorch module's output.
    return out_pad[:B, :O][:, None, :]


def _reference_forward(input_, actions, params):
    """Pure-JAX f32 reference mirroring torch.nn.LSTM + Linear semantics."""
    if input_.ndim > 3:
        input_ = input_.reshape(input_.shape[0], input_.shape[1], -1)
    if actions.ndim < 3:
        actions = actions[None, ...]
    x = jnp.concatenate([input_, actions], axis=-1)                     # (B, T, L)
    B, T, _ = x.shape
    H = params["w_hh_l0"].shape[1]

    def cell(h, c, gates):
        i = jax.nn.sigmoid(gates[:, :H])
        f = jax.nn.sigmoid(gates[:, H:2 * H])
        g = jnp.tanh(gates[:, 2 * H:3 * H])
        o = jax.nn.sigmoid(gates[:, 3 * H:])
        c = f * c + i * g
        return o * jnp.tanh(c), c

    h0 = c0 = h1 = c1 = jnp.zeros((B, H), jnp.float32)
    for t in range(T):
        g0 = (x[:, t, :] @ params["w_ih_l0"].T + params["b_ih_l0"]
              + h0 @ params["w_hh_l0"].T + params["b_hh_l0"])
        h0, c0 = cell(h0, c0, g0)
        g1 = (h0 @ params["w_ih_l1"].T + params["b_ih_l1"]
              + h1 @ params["w_hh_l1"].T + params["b_hh_l1"])
        h1, c1 = cell(h1, c1, g1)
    return (h1 @ params["w_lin"].T + params["b_lin"])[:, None, :]


if __name__ == "__main__":
    key = jax.random.PRNGKey(0)
    k_in, k_act, k_par = jax.random.split(key, 3)

    # Small shapes consistent with the module:
    #   input_ : (B=2, T=8, 3, 4)  -> flatten(2) -> (2, 8, 12)
    #   actions: (B=2, T=8, 4)
    #   latent_space = 12 + 4 = 16, hidden_size = 32, output_size = 8
    B, T = 2, 8
    input_ = jax.random.normal(k_in, (B, T, 3, 4), jnp.float32)
    actions = jax.random.normal(k_act, (B, T, 4), jnp.float32)

    latent_space, hidden_size, output_size = 16, 32, 8
    params = init_params(k_par, latent_space, hidden_size, output_size)

    out = lstm_predictor_forward(input_, actions, params)
    out = jax.block_until_ready(out)
    assert out.shape == (B, 1, output_size)

    ref = _reference_forward(input_, actions, params)
    # bf16 matmul operands (f32 accumulation) vs. pure-f32 reference -> relaxed tolerance.
    assert jnp.allclose(out, ref, atol=1e-2, rtol=1e-2), \
        f"max abs err {jnp.max(jnp.abs(out - ref))}"

    print("KERNEL_OK")
</pallas_src>

<mosaic_0001>
module attributes {stable_mosaic.version = 11 : i64} {
  func.func @lstm_predictor_kernel(%arg0: i32, %arg1: memref<8x8x128xf32, #tpu.memory_space<vmem>>, %arg2: memref<32x128xbf16, #tpu.memory_space<vmem>>, %arg3: memref<32x128xbf16, #tpu.memory_space<vmem>>, %arg4: memref<32x128xbf16, #tpu.memory_space<vmem>>, %arg5: memref<1x128xf32, #tpu.memory_space<vmem>>, %arg6: memref<32x128xf32, #tpu.memory_space<vmem>>, %arg7: memref<1x128xf32, #tpu.memory_space<vmem>>, %arg8: memref<8x128xf32, #tpu.memory_space<vmem>>) attributes {dimension_semantics = [#tpu.dimension_semantics<parallel>], iteration_bounds = array<i64: 1>, scalar_prefetch = 0 : i64, scratch_operands = 0 : i64, tpu.core_type = #tpu.core_type<tc>, window_params = [{transform_indices = @transform_0, window_bounds = array<i64: 8, 8, 128>}, {pipeline_mode = #tpu.pipeline_mode<synchronous>, transform_indices = @transform_1, window_bounds = array<i64: 32, 128>}, {pipeline_mode = #tpu.pipeline_mode<synchronous>, transform_indices = @transform_2, window_bounds = array<i64: 32, 128>}, {pipeline_mode = #tpu.pipeline_mode<synchronous>, transform_indices = @transform_3, window_bounds = array<i64: 32, 128>}, {pipeline_mode = #tpu.pipeline_mode<synchronous>, transform_indices = @transform_4, window_bounds = array<i64: 1, 128>}, {pipeline_mode = #tpu.pipeline_mode<synchronous>, transform_indices = @transform_5, window_bounds = array<i64: 32, 128>}, {pipeline_mode = #tpu.pipeline_mode<synchronous>, transform_indices = @transform_6, window_bounds = array<i64: 1, 128>}, {transform_indices = @transform_7, window_bounds = array<i64: 8, 128>}]} {
    %c0 = arith.constant 0 : index
    %c0_0 = arith.constant 0 : index
    %0 = vector.load %arg2[%c0, %c0_0] : memref<32x128xbf16, #tpu.memory_space<vmem>>, vector<32x128xbf16>
    %c0_1 = arith.constant 0 : index
    %c0_2 = arith.constant 0 : index
    %1 = vector.load %arg3[%c0_1, %c0_2] : memref<32x128xbf16, #tpu.memory_space<vmem>>, vector<32x128xbf16>
    %c0_3 = arith.constant 0 : index
    %c0_4 = arith.constant 0 : index
    %2 = vector.load %arg4[%c0_3, %c0_4] : memref<32x128xbf16, #tpu.memory_space<vmem>>, vector<32x128xbf16>
    %c0_5 = arith.constant 0 : index
    %c0_6 = arith.constant 0 : index
    %3 = vector.load %arg5[%c0_5, %c0_6] : memref<1x128xf32, #tpu.memory_space<vmem>>, vector<1x128xf32>
    %cst = arith.constant 0.000000e+00 : f32
    %4 = vector.broadcast %cst : f32 to vector<8x32xf32>
    %cst_7 = arith.constant 0.000000e+00 : f32
    %5 = vector.broadcast %cst_7 : f32 to vector<8x32xf32>
    %cst_8 = arith.constant 0.000000e+00 : f32
    %6 = vector.broadcast %cst_8 : f32 to vector<8x32xf32>
    %cst_9 = arith.constant 0.000000e+00 : f32
    %7 = vector.broadcast %cst_9 : f32 to vector<8x32xf32>
    %8 = arith.truncf %6 : vector<8x32xf32> to vector<8x32xbf16>
    %cst_10 = arith.constant dense<0.000000e+00> : vector<8x128xf32>
    %9 = tpu.matmul %8, %2, %cst_10 {dimension_numbers = #tpu.dot_dimension_numbers<[1], [0], [0], [1], [0, 0, 1, 1], [], []>} : vector<8x32xbf16>, vector<32x128xbf16>, vector<8x128xf32> -> vector<8x128xf32>
    %c0_11 = arith.constant 0 : index
    %c0_12 = arith.constant 0 : index
    %c0_13 = arith.constant 0 : index
    %10 = vector.load %arg1[%c0_11, %c0_12, %c0_13] : memref<8x8x128xf32, #tpu.memory_space<vmem>>, vector<1x8x128xf32>
    %11 = vector.shape_cast %10 : vector<1x8x128xf32> to vector<8x128xf32>
    %12 = arith.truncf %4 : vector<8x32xf32> to vector<8x32xbf16>
    %cst_14 = arith.constant dense<0.000000e+00> : vector<8x128xf32>
    %13 = tpu.matmul %12, %0, %cst_14 {dimension_numbers = #tpu.dot_dimension_numbers<[1], [0], [0], [1], [0, 0, 1, 1], [], []>} : vector<8x32xbf16>, vector<32x128xbf16>, vector<8x128xf32> -> vector<8x128xf32>
    %14 = arith.addf %11, %13 : vector<8x128xf32>
    %cst_15 = arith.constant 5.000000e-01 : f32
    %15 = vector.broadcast %cst_15 : f32 to vector<8x128xf32>
    %16 = arith.mulf %15, %14 : vector<8x128xf32>
    %17 = math.tanh %16 : vector<8x128xf32>
    %cst_16 = arith.constant 5.000000e-01 : f32
    %18 = vector.broadcast %cst_16 : f32 to vector<8x128xf32>
    %19 = arith.mulf %18, %17 : vector<8x128xf32>
    %cst_17 = arith.constant 5.000000e-01 : f32
    %20 = vector.broadcast %cst_17 : f32 to vector<8x128xf32>
    %21 = arith.addf %19, %20 : vector<8x128xf32>
    %22 = math.tanh %14 : vector<8x128xf32>
    %23 = vector.extract_strided_slice %21 {offsets = [0, 0], sizes = [8, 32], strides = [1, 1]} : vector<8x128xf32> to vector<8x32xf32>
    %24 = vector.extract_strided_slice %21 {offsets = [0, 32], sizes = [8, 32], strides = [1, 1]} : vector<8x128xf32> to vector<8x32xf32>
    %25 = vector.extract_strided_slice %22 {offsets = [0, 64], sizes = [8, 32], strides = [1, 1]} : vector<8x128xf32> to vector<8x32xf32>
    %26 = vector.extract_strided_slice %21 {offsets = [0, 96], sizes = [8, 32], strides = [1, 1]} : vector<8x128xf32> to vector<8x32xf32>
    %27 = arith.mulf %24, %5 : vector<8x32xf32>
    %28 = arith.mulf %23, %25 : vector<8x32xf32>
    %29 = arith.addf %27, %28 : vector<8x32xf32>
    %30 = math.tanh %29 : vector<8x32xf32>
    %31 = arith.mulf %26, %30 : vector<8x32xf32>
    %32 = arith.truncf %31 : vector<8x32xf32> to vector<8x32xbf16>
    %cst_18 = arith.constant dense<0.000000e+00> : vector<8x128xf32>
    %33 = tpu.matmul %32, %1, %cst_18 {dimension_numbers = #tpu.dot_dimension_numbers<[1], [0], [0], [1], [0, 0, 1, 1], [], []>} : vector<8x32xbf16>, vector<32x128xbf16>, vector<8x128xf32> -> vector<8x128xf32>
    %34 = arith.addf %9, %33 : vector<8x128xf32>
    %35 = vector.broadcast %3 : vector<1x128xf32> to vector<8x128xf32>
    %36 = arith.addf %34, %35 : vector<8x128xf32>
    %cst_19 = arith.constant 5.000000e-01 : f32
    %37 = vector.broadcast %cst_19 : f32 to vector<8x128xf32>
    %38 = arith.mulf %37, %36 : vector<8x128xf32>
    %39 = math.tanh %38 : vector<8x128xf32>
    %cst_20 = arith.constant 5.000000e-01 : f32
    %40 = vector.broadcast %cst_20 : f32 to vector<8x128xf32>
    %41 = arith.mulf %40, %39 : vector<8x128xf32>
    %cst_21 = arith.constant 5.000000e-01 : f32
    %42 = vector.broadcast %cst_21 : f32 to vector<8x128xf32>
    %43 = arith.addf %41, %42 : vector<8x128xf32>
    %44 = math.tanh %36 : vector<8x128xf32>
    %45 = vector.extract_strided_slice %43 {offsets = [0, 0], sizes = [8, 32], strides = [1, 1]} : vector<8x128xf32> to vector<8x32xf32>
    %46 = vector.extract_strided_slice %43 {offsets = [0, 32], sizes = [8, 32], strides = [1, 1]} : vector<8x128xf32> to vector<8x32xf32>
    %47 = vector.extract_strided_slice %44 {offsets = [0, 64], sizes = [8, 32], strides = [1, 1]} : vector<8x128xf32> to vector<8x32xf32>
    %48 = vector.extract_strided_slice %43 {offsets = [0, 96], sizes = [8, 32], strides = [1, 1]} : vector<8x128xf32> to vector<8x32xf32>
    %49 = arith.mulf %46, %7 : vector<8x32xf32>
    %50 = arith.mulf %45, %47 : vector<8x32xf32>
    %51 = arith.addf %49, %50 : vector<8x32xf32>
    %52 = math.tanh %51 : vector<8x32xf32>
    %53 = arith.mulf %48, %52 : vector<8x32xf32>
    %54 = arith.truncf %53 : vector<8x32xf32> to vector<8x32xbf16>
    %cst_22 = arith.constant dense<0.000000e+00> : vector<8x128xf32>
    %55 = tpu.matmul %54, %2, %cst_22 {dimension_numbers = #tpu.dot_dimension_numbers<[1], [0], [0], [1], [0, 0, 1, 1], [], []>} : vector<8x32xbf16>, vector<32x128xbf16>, vector<8x128xf32> -> vector<8x128xf32>
    %c1 = arith.constant 1 : index
    %c0_23 = arith.constant 0 : index
    %c0_24 = arith.constant 0 : index
    %56 = vector.load %arg1[%c1, %c0_23, %c0_24] : memref<8x8x128xf32, #tpu.memory_space<vmem>>, vector<1x8x128xf32>
    %57 = vector.shape_cast %56 : vector<1x8x128xf32> to vector<8x128xf32>
    %58 = arith.truncf %31 : vector<8x32xf32> to vector<8x32xbf16>
    %cst_25 = arith.constant dense<0.000000e+00> : vector<8x128xf32>
    %59 = tpu.matmul %58, %0, %cst_25 {dimension_numbers = #tpu.dot_dimension_numbers<[1], [0], [0], [1], [0, 0, 1, 1], [], []>} : vector<8x32xbf16>, vector<32x128xbf16>, vector<8x128xf32> -> vector<8x128xf32>
    %60 = arith.addf %57, %59 : vector<8x128xf32>
    %cst_26 = arith.constant 5.000000e-01 : f32
    %61 = vector.broadcast %cst_26 : f32 to vector<8x128xf32>
    %62 = arith.mulf %61, %60 : vector<8x128xf32>
    %63 = math.tanh %62 : vector<8x128xf32>
    %cst_27 = arith.constant 5.000000e-01 : f32
    %64 = vector.broadcast %cst_27 : f32 to vector<8x128xf32>
    %65 = arith.mulf %64, %63 : vector<8x128xf32>
    %cst_28 = arith.constant 5.000000e-01 : f32
    %66 = vector.broadcast %cst_28 : f32 to vector<8x128xf32>
    %67 = arith.addf %65, %66 : vector<8x128xf32>
    %68 = math.tanh %60 : vector<8x128xf32>
    %69 = vector.extract_strided_slice %67 {offsets = [0, 0], sizes = [8, 32], strides = [1, 1]} : vector<8x128xf32> to vector<8x32xf32>
    %70 = vector.extract_strided_slice %67 {offsets = [0, 32], sizes = [8, 32], strides = [1, 1]} : vector<8x128xf32> to vector<8x32xf32>
    %71 = vector.extract_strided_slice %68 {offsets = [0, 64], sizes = [8, 32], strides = [1, 1]} : vector<8x128xf32> to vector<8x32xf32>
    %72 = vector.extract_strided_slice %67 {offsets = [0, 96], sizes = [8, 32], strides = [1, 1]} : vector<8x128xf32> to vector<8x32xf32>
    %73 = arith.mulf %70, %29 : vector<8x32xf32>
    %74 = arith.mulf %69, %71 : vector<8x32xf32>
    %75 = arith.addf %73, %74 : vector<8x32xf32>
    %76 = math.tanh %75 : vector<8x32xf32>
    %77 = arith.mulf %72, %76 : vector<8x32xf32>
    %78 = arith.truncf %77 : vector<8x32xf32> to vector<8x32xbf16>
    %cst_29 = arith.constant dense<0.000000e+00> : vector<8x128xf32>
    %79 = tpu.matmul %78, %1, %cst_29 {dimension_numbers = #tpu.dot_dimension_numbers<[1], [0], [0], [1], [0, 0, 1, 1], [], []>} : vector<8x32xbf16>, vector<32x128xbf16>, vector<8x128xf32> -> vector<8x128xf32>
    %80 = arith.addf %55, %79 : vector<8x128xf32>
    %81 = vector.broadcast %3 : vector<1x128xf32> to vector<8x128xf32>
    %82 = arith.addf %80, %81 : vector<8x128xf32>
    %cst_30 = arith.constant 5.000000e-01 : f32
    %83 = vector.broadcast %cst_30 : f32 to vector<8x128xf32>
    %84 = arith.mulf %83, %82 : vector<8x128xf32>
    %85 = math.tanh %84 : vector<8x128xf32>
    %cst_31 = arith.constant 5.000000e-01 : f32
    %86 = vector.broadcast %cst_31 : f32 to vector<8x128xf32>
    %87 = arith.mulf %86, %85 : vector<8x128xf32>
    %cst_32 = arith.constant 5.000000e-01 : f32
    %88 = vector.broadcast %cst_32 : f32 to vector<8x128xf32>
    %89 = arith.addf %87, %88 : vector<8x128xf32>
    %90 = math.tanh %82 : vector<8x128xf32>
    %91 = vector.extract_strided_slice %89 {offsets = [0, 0], sizes = [8, 32], strides = [1, 1]} : vector<8x128xf32> to vector<8x32xf32>
    %92 = vector.extract_strided_slice %89 {offsets = [0, 32], sizes = [8, 32], strides = [1, 1]} : vector<8x128xf32> to vector<8x32xf32>
    %93 = vector.extract_strided_slice %90 {offsets = [0, 64], sizes = [8, 32], strides = [1, 1]} : vector<8x128xf32> to vector<8x32xf32>
    %94 = vector.extract_strided_slice %89 {offsets = [0, 96], sizes = [8, 32], strides = [1, 1]} : vector<8x128xf32> to vector<8x32xf32>
    %95 = arith.mulf %92, %51 : vector<8x32xf32>
    %96 = arith.mulf %91, %93 : vector<8x32xf32>
    %97 = arith.addf %95, %96 : vector<8x32xf32>
    %98 = math.tanh %97 : vector<8x32xf32>
    %99 = arith.mulf %94, %98 : vector<8x32xf32>
    %100 = arith.truncf %99 : vector<8x32xf32> to vector<8x32xbf16>
    %cst_33 = arith.constant dense<0.000000e+00> : vector<8x128xf32>
    %101 = tpu.matmul %100, %2, %cst_33 {dimension_numbers = #tpu.dot_dimension_numbers<[1], [0], [0], [1], [0, 0, 1, 1], [], []>} : vector<8x32xbf16>, vector<32x128xbf16>, vector<8x128xf32> -> vector<8x128xf32>
    %c2 = arith.constant 2 : index
    %c0_34 = arith.constant 0 : index
    %c0_35 = arith.constant 0 : index
    %102 = vector.load %arg1[%c2, %c0_34, %c0_35] : memref<8x8x128xf32, #tpu.memory_space<vmem>>, vector<1x8x128xf32>
    %103 = vector.shape_cast %102 : vector<1x8x128xf32> to vector<8x128xf32>
    %104 = arith.truncf %77 : vector<8x32xf32> to vector<8x32xbf16>
    %cst_36 = arith.constant dense<0.000000e+00> : vector<8x128xf32>
    %105 = tpu.matmul %104, %0, %cst_36 {dimension_numbers = #tpu.dot_dimension_numbers<[1], [0], [0], [1], [0, 0, 1, 1], [], []>} : vector<8x32xbf16>, vector<32x128xbf16>, vector<8x128xf32> -> vector<8x128xf32>
    %106 = arith.addf %103, %105 : vector<8x128xf32>
    %cst_37 = arith.constant 5.000000e-01 : f32
    %107 = vector.broadcast %cst_37 : f32 to vector<8x128xf32>
    %108 = arith.mulf %107, %106 : vector<8x128xf32>
    %109 = math.tanh %108 : vector<8x128xf32>
    %cst_38 = arith.constant 5.000000e-01 : f32
    %110 = vector.broadcast %cst_38 : f32 to vector<8x128xf32>
    %111 = arith.mulf %110, %109 : vector<8x128xf32>
    %cst_39 = arith.constant 5.000000e-01 : f32
    %112 = vector.broadcast %cst_39 : f32 to vector<8x128xf32>
    %113 = arith.addf %111, %112 : vector<8x128xf32>
    %114 = math.tanh %106 : vector<8x128xf32>
    %115 = vector.extract_strided_slice %113 {offsets = [0, 0], sizes = [8, 32], strides = [1, 1]} : vector<8x128xf32> to vector<8x32xf32>
    %116 = vector.extract_strided_slice %113 {offsets = [0, 32], sizes = [8, 32], strides = [1, 1]} : vector<8x128xf32> to vector<8x32xf32>
    %117 = vector.extract_strided_slice %114 {offsets = [0, 64], sizes = [8, 32], strides = [1, 1]} : vector<8x128xf32> to vector<8x32xf32>
    %118 = vector.extract_strided_slice %113 {offsets = [0, 96], sizes = [8, 32], strides = [1, 1]} : vector<8x128xf32> to vector<8x32xf32>
    %119 = arith.mulf %116, %75 : vector<8x32xf32>
    %120 = arith.mulf %115, %117 : vector<8x32xf32>
    %121 = arith.addf %119, %120 : vector<8x32xf32>
    %122 = math.tanh %121 : vector<8x32xf32>
    %123 = arith.mulf %118, %122 : vector<8x32xf32>
    %124 = arith.truncf %123 : vector<8x32xf32> to vector<8x32xbf16>
    %cst_40 = arith.constant dense<0.000000e+00> : vector<8x128xf32>
    %125 = tpu.matmul %124, %1, %cst_40 {dimension_numbers = #tpu.dot_dimension_numbers<[1], [0], [0], [1], [0, 0, 1, 1], [], []>} : vector<8x32xbf16>, vector<32x128xbf16>, vector<8x128xf32> -> vector<8x128xf32>
    %126 = arith.addf %101, %125 : vector<8x128xf32>
    %127 = vector.broadcast %3 : vector<1x128xf32> to vector<8x128xf32>
    %128 = arith.addf %126, %127 : vector<8x128xf32>
    %cst_41 = arith.constant 5.000000e-01 : f32
    %129 = vector.broadcast %cst_41 : f32 to vector<8x128xf32>
    %130 = arith.mulf %129, %128 : vector<8x128xf32>
    %131 = math.tanh %130 : vector<8x128xf32>
    %cst_42 = arith.constant 5.000000e-01 : f32
    %132 = vector.broadcast %cst_42 : f32 to vector<8x128xf32>
    %133 = arith.mulf %132, %131 : vector<8x128xf32>
    %cst_43 = arith.constant 5.000000e-01 : f32
    %134 = vector.broadcast %cst_43 : f32 to vector<8x128xf32>
    %135 = arith.addf %133, %134 : vector<8x128xf32>
    %136 = math.tanh %128 : vector<8x128xf32>
    %137 = vector.extract_strided_slice %135 {offsets = [0, 0], sizes = [8, 32], strides = [1, 1]} : vector<8x128xf32> to vector<8x32xf32>
    %138 = vector.extract_strided_slice %135 {offsets = [0, 32], sizes = [8, 32], strides = [1, 1]} : vector<8x128xf32> to vector<8x32xf32>
    %139 = vector.extract_strided_slice %136 {offsets = [0, 64], sizes = [8, 32], strides = [1, 1]} : vector<8x128xf32> to vector<8x32xf32>
    %140 = vector.extract_strided_slice %135 {offsets = [0, 96], sizes = [8, 32], strides = [1, 1]} : vector<8x128xf32> to vector<8x32xf32>
    %141 = arith.mulf %138, %97 : vector<8x32xf32>
    %142 = arith.mulf %137, %139 : vector<8x32xf32>
    %143 = arith.addf %141, %142 : vector<8x32xf32>
    %144 = math.tanh %143 : vector<8x32xf32>
    %145 = arith.mulf %140, %144 : vector<8x32xf32>
    %146 = arith.truncf %145 : vector<8x32xf32> to vector<8x32xbf16>
    %cst_44 = arith.constant dense<0.000000e+00> : vector<8x128xf32>
    %147 = tpu.matmul %146, %2, %cst_44 {dimension_numbers = #tpu.dot_dimension_numbers<[1], [0], [0], [1], [0, 0, 1, 1], [], []>} : vector<8x32xbf16>, vector<32x128xbf16>, vector<8x128xf32> -> vector<8x128xf32>
    %c3 = arith.constant 3 : index
    %c0_45 = arith.constant 0 : index
    %c0_46 = arith.constant 0 : index
    %148 = vector.load %arg1[%c3, %c0_45, %c0_46] : memref<8x8x128xf32, #tpu.memory_space<vmem>>, vector<1x8x128xf32>
    %149 = vector.shape_cast %148 : vector<1x8x128xf32> to vector<8x128xf32>
    %150 = arith.truncf %123 : vector<8x32xf32> to vector<8x32xbf16>
    %cst_47 = arith.constant dense<0.000000e+00> : vector<8x128xf32>
    %151 = tpu.matmul %150, %0, %cst_47 {dimension_numbers = #tpu.dot_dimension_numbers<[1], [0], [0], [1], [0, 0, 1, 1], [], []>} : vector<8x32xbf16>, vector<32x128xbf16>, vector<8x128xf32> -> vector<8x128xf32>
    %152 = arith.addf %149, %151 : vector<8x128xf32>
    %cst_48 = arith.constant 5.000000e-01 : f32
    %153 = vector.broadcast %cst_48 : f32 to vector<8x128xf32>
    %154 = arith.mulf %153, %152 : vector<8x128xf32>
    %155 = math.tanh %154 : vector<8x128xf32>
    %cst_49 = arith.constant 5.000000e-01 : f32
    %156 = vector.broadcast %cst_49 : f32 to vector<8x128xf32>
    %157 = arith.mulf %156, %155 : vector<8x128xf32>
    %cst_50 = arith.constant 5.000000e-01 : f32
    %158 = vector.broadcast %cst_50 : f32 to vector<8x128xf32>
    %159 = arith.addf %157, %158 : vector<8x128xf32>
    %160 = math.tanh %152 : vector<8x128xf32>
    %161 = vector.extract_strided_slice %159 {offsets = [0, 0], sizes = [8, 32], strides = [1, 1]} : vector<8x128xf32> to vector<8x32xf32>
    %162 = vector.extract_strided_slice %159 {offsets = [0, 32], sizes = [8, 32], strides = [1, 1]} : vector<8x128xf32> to vector<8x32xf32>
    %163 = vector.extract_strided_slice %160 {offsets = [0, 64], sizes = [8, 32], strides = [1, 1]} : vector<8x128xf32> to vector<8x32xf32>
    %164 = vector.extract_strided_slice %159 {offsets = [0, 96], sizes = [8, 32], strides = [1, 1]} : vector<8x128xf32> to vector<8x32xf32>
    %165 = arith.mulf %162, %121 : vector<8x32xf32>
    %166 = arith.mulf %161, %163 : vector<8x32xf32>
    %167 = arith.addf %165, %166 : vector<8x32xf32>
    %168 = math.tanh %167 : vector<8x32xf32>
    %169 = arith.mulf %164, %168 : vector<8x32xf32>
    %170 = arith.truncf %169 : vector<8x32xf32> to vector<8x32xbf16>
    %cst_51 = arith.constant dense<0.000000e+00> : vector<8x128xf32>
    %171 = tpu.matmul %170, %1, %cst_51 {dimension_numbers = #tpu.dot_dimension_numbers<[1], [0], [0], [1], [0, 0, 1, 1], [], []>} : vector<8x32xbf16>, vector<32x128xbf16>, vector<8x128xf32> -> vector<8x128xf32>
    %172 = arith.addf %147, %171 : vector<8x128xf32>
    %173 = vector.broadcast %3 : vector<1x128xf32> to vector<8x128xf32>
    %174 = arith.addf %172, %173 : vector<8x128xf32>
    %cst_52 = arith.constant 5.000000e-01 : f32
    %175 = vector.broadcast %cst_52 : f32 to vector<8x128xf32>
    %176 = arith.mulf %175, %174 : vector<8x128xf32>
    %177 = math.tanh %176 : vector<8x128xf32>
    %cst_53 = arith.constant 5.000000e-01 : f32
    %178 = vector.broadcast %cst_53 : f32 to vector<8x128xf32>
    %179 = arith.mulf %178, %177 : vector<8x128xf32>
    %cst_54 = arith.constant 5.000000e-01 : f32
    %180 = vector.broadcast %cst_54 : f32 to vector<8x128xf32>
    %181 = arith.addf %179, %180 : vector<8x128xf32>
    %182 = math.tanh %174 : vector<8x128xf32>
    %183 = vector.extract_strided_slice %181 {offsets = [0, 0], sizes = [8, 32], strides = [1, 1]} : vector<8x128xf32> to vector<8x32xf32>
    %184 = vector.extract_strided_slice %181 {offsets = [0, 32], sizes = [8, 32], strides = [1, 1]} : vector<8x128xf32> to vector<8x32xf32>
    %185 = vector.extract_strided_slice %182 {offsets = [0, 64], sizes = [8, 32], strides = [1, 1]} : vector<8x128xf32> to vector<8x32xf32>
    %186 = vector.extract_strided_slice %181 {offsets = [0, 96], sizes = [8, 32], strides = [1, 1]} : vector<8x128xf32> to vector<8x32xf32>
    %187 = arith.mulf %184, %143 : vector<8x32xf32>
    %188 = arith.mulf %183, %185 : vector<8x32xf32>
    %189 = arith.addf %187, %188 : vector<8x32xf32>
    %190 = math.tanh %189 : vector<8x32xf32>
    %191 = arith.mulf %186, %190 : vector<8x32xf32>
    %192 = arith.truncf %191 : vector<8x32xf32> to vector<8x32xbf16>
    %cst_55 = arith.constant dense<0.000000e+00> : vector<8x128xf32>
    %193 = tpu.matmul %192, %2, %cst_55 {dimension_numbers = #tpu.dot_dimension_numbers<[1], [0], [0], [1], [0, 0, 1, 1], [], []>} : vector<8x32xbf16>, vector<32x128xbf16>, vector<8x128xf32> -> vector<8x128xf32>
    %c4 = arith.constant 4 : index
    %c0_56 = arith.constant 0 : index
    %c0_57 = arith.constant 0 : index
    %194 = vector.load %arg1[%c4, %c0_56, %c0_57] : memref<8x8x128xf32, #tpu.memory_space<vmem>>, vector<1x8x128xf32>
    %195 = vector.shape_cast %194 : vector<1x8x128xf32> to vector<8x128xf32>
    %196 = arith.truncf %169 : vector<8x32xf32> to vector<8x32xbf16>
    %cst_58 = arith.constant dense<0.000000e+00> : vector<8x128xf32>
    %197 = tpu.matmul %196, %0, %cst_58 {dimension_numbers = #tpu.dot_dimension_numbers<[1], [0], [0], [1], [0, 0, 1, 1], [], []>} : vector<8x32xbf16>, vector<32x128xbf16>, vector<8x128xf32> -> vector<8x128xf32>
    %198 = arith.addf %195, %197 : vector<8x128xf32>
    %cst_59 = arith.constant 5.000000e-01 : f32
    %199 = vector.broadcast %cst_59 : f32 to vector<8x128xf32>
    %200 = arith.mulf %199, %198 : vector<8x128xf32>
    %201 = math.tanh %200 : vector<8x128xf32>
    %cst_60 = arith.constant 5.000000e-01 : f32
    %202 = vector.broadcast %cst_60 : f32 to vector<8x128xf32>
    %203 = arith.mulf %202, %201 : vector<8x128xf32>
    %cst_61 = arith.constant 5.000000e-01 : f32
    %204 = vector.broadcast %cst_61 : f32 to vector<8x128xf32>
    %205 = arith.addf %203, %204 : vector<8x128xf32>
    %206 = math.tanh %198 : vector<8x128xf32>
    %207 = vector.extract_strided_slice %205 {offsets = [0, 0], sizes = [8, 32], strides = [1, 1]} : vector<8x128xf32> to vector<8x32xf32>
    %208 = vector.extract_strided_slice %205 {offsets = [0, 32], sizes = [8, 32], strides = [1, 1]} : vector<8x128xf32> to vector<8x32xf32>
    %209 = vector.extract_strided_slice %206 {offsets = [0, 64], sizes = [8, 32], strides = [1, 1]} : vector<8x128xf32> to vector<8x32xf32>
    %210 = vector.extract_strided_slice %205 {offsets = [0, 96], sizes = [8, 32], strides = [1, 1]} : vector<8x128xf32> to vector<8x32xf32>
    %211 = arith.mulf %208, %167 : vector<8x32xf32>
    %212 = arith.mulf %207, %209 : vector<8x32xf32>
    %213 = arith.addf %211, %212 : vector<8x32xf32>
    %214 = math.tanh %213 : vector<8x32xf32>
    %215 = arith.mulf %210, %214 : vector<8x32xf32>
    %216 = arith.truncf %215 : vector<8x32xf32> to vector<8x32xbf16>
    %cst_62 = arith.constant dense<0.000000e+00> : vector<8x128xf32>
    %217 = tpu.matmul %216, %1, %cst_62 {dimension_numbers = #tpu.dot_dimension_numbers<[1], [0], [0], [1], [0, 0, 1, 1], [], []>} : vector<8x32xbf16>, vector<32x128xbf16>, vector<8x128xf32> -> vector<8x128xf32>
    %218 = arith.addf %193, %217 : vector<8x128xf32>
    %219 = vector.broadcast %3 : vector<1x128xf32> to vector<8x128xf32>
    %220 = arith.addf %218, %219 : vector<8x128xf32>
    %cst_63 = arith.constant 5.000000e-01 : f32
    %221 = vector.broadcast %cst_63 : f32 to vector<8x128xf32>
    %222 = arith.mulf %221, %220 : vector<8x128xf32>
    %223 = math.tanh %222 : vector<8x128xf32>
    %cst_64 = arith.constant 5.000000e-01 : f32
    %224 = vector.broadcast %cst_64 : f32 to vector<8x128xf32>
    %225 = arith.mulf %224, %223 : vector<8x128xf32>
    %cst_65 = arith.constant 5.000000e-01 : f32
    %226 = vector.broadcast %cst_65 : f32 to vector<8x128xf32>
    %227 = arith.addf %225, %226 : vector<8x128xf32>
    %228 = math.tanh %220 : vector<8x128xf32>
    %229 = vector.extract_strided_slice %227 {offsets = [0, 0], sizes = [8, 32], strides = [1, 1]} : vector<8x128xf32> to vector<8x32xf32>
    %230 = vector.extract_strided_slice %227 {offsets = [0, 32], sizes = [8, 32], strides = [1, 1]} : vector<8x128xf32> to vector<8x32xf32>
    %231 = vector.extract_strided_slice %228 {offsets = [0, 64], sizes = [8, 32], strides = [1, 1]} : vector<8x128xf32> to vector<8x32xf32>
    %232 = vector.extract_strided_slice %227 {offsets = [0, 96], sizes = [8, 32], strides = [1, 1]} : vector<8x128xf32> to vector<8x32xf32>
    %233 = arith.mulf %230, %189 : vector<8x32xf32>
    %234 = arith.mulf %229, %231 : vector<8x32xf32>
    %235 = arith.addf %233, %234 : vector<8x32xf32>
    %236 = math.tanh %235 : vector<8x32xf32>
    %237 = arith.mulf %232, %236 : vector<8x32xf32>
    %238 = arith.truncf %237 : vector<8x32xf32> to vector<8x32xbf16>
    %cst_66 = arith.constant dense<0.000000e+00> : vector<8x128xf32>
    %239 = tpu.matmul %238, %2, %cst_66 {dimension_numbers = #tpu.dot_dimension_numbers<[1], [0], [0], [1], [0, 0, 1, 1], [], []>} : vector<8x32xbf16>, vector<32x128xbf16>, vector<8x128xf32> -> vector<8x128xf32>
    %c5 = arith.constant 5 : index
    %c0_67 = arith.constant 0 : index
    %c0_68 = arith.constant 0 : index
    %240 = vector.load %arg1[%c5, %c0_67, %c0_68] : memref<8x8x128xf32, #tpu.memory_space<vmem>>, vector<1x8x128xf32>
    %241 = vector.shape_cast %240 : vector<1x8x128xf32> to vector<8x128xf32>
    %242 = arith.truncf %215 : vector<8x32xf32> to vector<8x32xbf16>
    %cst_69 = arith.constant dense<0.000000e+00> : vector<8x128xf32>
    %243 = tpu.matmul %242, %0, %cst_69 {dimension_numbers = #tpu.dot_dimension_numbers<[1], [0], [0], [1], [0, 0, 1, 1], [], []>} : vector<8x32xbf16>, vector<32x128xbf16>, vector<8x128xf32> -> vector<8x128xf32>
    %244 = arith.addf %241, %243 : vector<8x128xf32>
    %cst_70 = arith.constant 5.000000e-01 : f32
    %245 = vector.broadcast %cst_70 : f32 to vector<8x128xf32>
    %246 = arith.mulf %245, %244 : vector<8x128xf32>
    %247 = math.tanh %246 : vector<8x128xf32>
    %cst_71 = arith.constant 5.000000e-01 : f32
    %248 = vector.broadcast %cst_71 : f32 to vector<8x128xf32>
    %249 = arith.mulf %248, %247 : vector<8x128xf32>
    %cst_72 = arith.constant 5.000000e-01 : f32
    %250 = vector.broadcast %cst_72 : f32 to vector<8x128xf32>
    %251 = arith.addf %249, %250 : vector<8x128xf32>
    %252 = math.tanh %244 : vector<8x128xf32>
    %253 = vector.extract_strided_slice %251 {offsets = [0, 0], sizes = [8, 32], strides = [1, 1]} : vector<8x128xf32> to vector<8x32xf32>
    %254 = vector.extract_strided_slice %251 {offsets = [0, 32], sizes = [8, 32], strides = [1, 1]} : vector<8x128xf32> to vector<8x32xf32>
    %255 = vector.extract_strided_slice %252 {offsets = [0, 64], sizes = [8, 32], strides = [1, 1]} : vector<8x128xf32> to vector<8x32xf32>
    %256 = vector.extract_strided_slice %251 {offsets = [0, 96], sizes = [8, 32], strides = [1, 1]} : vector<8x128xf32> to vector<8x32xf32>
    %257 = arith.mulf %254, %213 : vector<8x32xf32>
    %258 = arith.mulf %253, %255 : vector<8x32xf32>
    %259 = arith.addf %257, %258 : vector<8x32xf32>
    %260 = math.tanh %259 : vector<8x32xf32>
    %261 = arith.mulf %256, %260 : vector<8x32xf32>
    %262 = arith.truncf %261 : vector<8x32xf32> to vector<8x32xbf16>
    %cst_73 = arith.constant dense<0.000000e+00> : vector<8x128xf32>
    %263 = tpu.matmul %262, %1, %cst_73 {dimension_numbers = #tpu.dot_dimension_numbers<[1], [0], [0], [1], [0, 0, 1, 1], [], []>} : vector<8x32xbf16>, vector<32x128xbf16>, vector<8x128xf32> -> vector<8x128xf32>
    %264 = arith.addf %239, %263 : vector<8x128xf32>
    %265 = vector.broadcast %3 : vector<1x128xf32> to vector<8x128xf32>
    %266 = arith.addf %264, %265 : vector<8x128xf32>
    %cst_74 = arith.constant 5.000000e-01 : f32
    %267 = vector.broadcast %cst_74 : f32 to vector<8x128xf32>
    %268 = arith.mulf %267, %266 : vector<8x128xf32>
    %269 = math.tanh %268 : vector<8x128xf32>
    %cst_75 = arith.constant 5.000000e-01 : f32
    %270 = vector.broadcast %cst_75 : f32 to vector<8x128xf32>
    %271 = arith.mulf %270, %269 : vector<8x128xf32>
    %cst_76 = arith.constant 5.000000e-01 : f32
    %272 = vector.broadcast %cst_76 : f32 to vector<8x128xf32>
    %273 = arith.addf %271, %272 : vector<8x128xf32>
    %274 = math.tanh %266 : vector<8x128xf32>
    %275 = vector.extract_strided_slice %273 {offsets = [0, 0], sizes = [8, 32], strides = [1, 1]} : vector<8x128xf32> to vector<8x32xf32>
    %276 = vector.extract_strided_slice %273 {offsets = [0, 32], sizes = [8, 32], strides = [1, 1]} : vector<8x128xf32> to vector<8x32xf32>
    %277 = vector.extract_strided_slice %274 {offsets = [0, 64], sizes = [8, 32], strides = [1, 1]} : vector<8x128xf32> to vector<8x32xf32>
    %278 = vector.extract_strided_slice %273 {offsets = [0, 96], sizes = [8, 32], strides = [1, 1]} : vector<8x128xf32> to vector<8x32xf32>
    %279 = arith.mulf %276, %235 : vector<8x32xf32>
    %280 = arith.mulf %275, %277 : vector<8x32xf32>
    %281 = arith.addf %279, %280 : vector<8x32xf32>
    %282 = math.tanh %281 : vector<8x32xf32>
    %283 = arith.mulf %278, %282 : vector<8x32xf32>
    %284 = arith.truncf %283 : vector<8x32xf32> to vector<8x32xbf16>
    %cst_77 = arith.constant dense<0.000000e+00> : vector<8x128xf32>
    %285 = tpu.matmul %284, %2, %cst_77 {dimension_numbers = #tpu.dot_dimension_numbers<[1], [0], [0], [1], [0, 0, 1, 1], [], []>} : vector<8x32xbf16>, vector<32x128xbf16>, vector<8x128xf32> -> vector<8x128xf32>
    %c6 = arith.constant 6 : index
    %c0_78 = arith.constant 0 : index
    %c0_79 = arith.constant 0 : index
    %286 = vector.load %arg1[%c6, %c0_78, %c0_79] : memref<8x8x128xf32, #tpu.memory_space<vmem>>, vector<1x8x128xf32>
    %287 = vector.shape_cast %286 : vector<1x8x128xf32> to vector<8x128xf32>
    %288 = arith.truncf %261 : vector<8x32xf32> to vector<8x32xbf16>
    %cst_80 = arith.constant dense<0.000000e+00> : vector<8x128xf32>
    %289 = tpu.matmul %288, %0, %cst_80 {dimension_numbers = #tpu.dot_dimension_numbers<[1], [0], [0], [1], [0, 0, 1, 1], [], []>} : vector<8x32xbf16>, vector<32x128xbf16>, vector<8x128xf32> -> vector<8x128xf32>
    %290 = arith.addf %287, %289 : vector<8x128xf32>
    %cst_81 = arith.constant 5.000000e-01 : f32
    %291 = vector.broadcast %cst_81 : f32 to vector<8x128xf32>
    %292 = arith.mulf %291, %290 : vector<8x128xf32>
    %293 = math.tanh %292 : vector<8x128xf32>
    %cst_82 = arith.constant 5.000000e-01 : f32
    %294 = vector.broadcast %cst_82 : f32 to vector<8x128xf32>
    %295 = arith.mulf %294, %293 : vector<8x128xf32>
    %cst_83 = arith.constant 5.000000e-01 : f32
    %296 = vector.broadcast %cst_83 : f32 to vector<8x128xf32>
    %297 = arith.addf %295, %296 : vector<8x128xf32>
    %298 = math.tanh %290 : vector<8x128xf32>
    %299 = vector.extract_strided_slice %297 {offsets = [0, 0], sizes = [8, 32], strides = [1, 1]} : vector<8x128xf32> to vector<8x32xf32>
    %300 = vector.extract_strided_slice %297 {offsets = [0, 32], sizes = [8, 32], strides = [1, 1]} : vector<8x128xf32> to vector<8x32xf32>
    %301 = vector.extract_strided_slice %298 {offsets = [0, 64], sizes = [8, 32], strides = [1, 1]} : vector<8x128xf32> to vector<8x32xf32>
    %302 = vector.extract_strided_slice %297 {offsets = [0, 96], sizes = [8, 32], strides = [1, 1]} : vector<8x128xf32> to vector<8x32xf32>
    %303 = arith.mulf %300, %259 : vector<8x32xf32>
    %304 = arith.mulf %299, %301 : vector<8x32xf32>
    %305 = arith.addf %303, %304 : vector<8x32xf32>
    %306 = math.tanh %305 : vector<8x32xf32>
    %307 = arith.mulf %302, %306 : vector<8x32xf32>
    %308 = arith.truncf %307 : vector<8x32xf32> to vector<8x32xbf16>
    %cst_84 = arith.constant dense<0.000000e+00> : vector<8x128xf32>
    %309 = tpu.matmul %308, %1, %cst_84 {dimension_numbers = #tpu.dot_dimension_numbers<[1], [0], [0], [1], [0, 0, 1, 1], [], []>} : vector<8x32xbf16>, vector<32x128xbf16>, vector<8x128xf32> -> vector<8x128xf32>
    %310 = arith.addf %285, %309 : vector<8x128xf32>
    %311 = vector.broadcast %3 : vector<1x128xf32> to vector<8x128xf32>
    %312 = arith.addf %310, %311 : vector<8x128xf32>
    %cst_85 = arith.constant 5.000000e-01 : f32
    %313 = vector.broadcast %cst_85 : f32 to vector<8x128xf32>
    %314 = arith.mulf %313, %312 : vector<8x128xf32>
    %315 = math.tanh %314 : vector<8x128xf32>
    %cst_86 = arith.constant 5.000000e-01 : f32
    %316 = vector.broadcast %cst_86 : f32 to vector<8x128xf32>
    %317 = arith.mulf %316, %315 : vector<8x128xf32>
    %cst_87 = arith.constant 5.000000e-01 : f32
    %318 = vector.broadcast %cst_87 : f32 to vector<8x128xf32>
    %319 = arith.addf %317, %318 : vector<8x128xf32>
    %320 = math.tanh %312 : vector<8x128xf32>
    %321 = vector.extract_strided_slice %319 {offsets = [0, 0], sizes = [8, 32], strides = [1, 1]} : vector<8x128xf32> to vector<8x32xf32>
    %322 = vector.extract_strided_slice %319 {offsets = [0, 32], sizes = [8, 32], strides = [1, 1]} : vector<8x128xf32> to vector<8x32xf32>
    %323 = vector.extract_strided_slice %320 {offsets = [0, 64], sizes = [8, 32], strides = [1, 1]} : vector<8x128xf32> to vector<8x32xf32>
    %324 = vector.extract_strided_slice %319 {offsets = [0, 96], sizes = [8, 32], strides = [1, 1]} : vector<8x128xf32> to vector<8x32xf32>
    %325 = arith.mulf %322, %281 : vector<8x32xf32>
    %326 = arith.mulf %321, %323 : vector<8x32xf32>
    %327 = arith.addf %325, %326 : vector<8x32xf32>
    %328 = math.tanh %327 : vector<8x32xf32>
    %329 = arith.mulf %324, %328 : vector<8x32xf32>
    %330 = arith.truncf %329 : vector<8x32xf32> to vector<8x32xbf16>
    %cst_88 = arith.constant dense<0.000000e+00> : vector<8x128xf32>
    %331 = tpu.matmul %330, %2, %cst_88 {dimension_numbers = #tpu.dot_dimension_numbers<[1], [0], [0], [1], [0, 0, 1, 1], [], []>} : vector<8x32xbf16>, vector<32x128xbf16>, vector<8x128xf32> -> vector<8x128xf32>
    %c7 = arith.constant 7 : index
    %c0_89 = arith.constant 0 : index
    %c0_90 = arith.constant 0 : index
    %332 = vector.load %arg1[%c7, %c0_89, %c0_90] : memref<8x8x128xf32, #tpu.memory_space<vmem>>, vector<1x8x128xf32>
    %333 = vector.shape_cast %332 : vector<1x8x128xf32> to vector<8x128xf32>
    %334 = arith.truncf %307 : vector<8x32xf32> to vector<8x32xbf16>
    %cst_91 = arith.constant dense<0.000000e+00> : vector<8x128xf32>
    %335 = tpu.matmul %334, %0, %cst_91 {dimension_numbers = #tpu.dot_dimension_numbers<[1], [0], [0], [1], [0, 0, 1, 1], [], []>} : vector<8x32xbf16>, vector<32x128xbf16>, vector<8x128xf32> -> vector<8x128xf32>
    %336 = arith.addf %333, %335 : vector<8x128xf32>
    %cst_92 = arith.constant 5.000000e-01 : f32
    %337 = vector.broadcast %cst_92 : f32 to vector<8x128xf32>
    %338 = arith.mulf %337, %336 : vector<8x128xf32>
    %339 = math.tanh %338 : vector<8x128xf32>
    %cst_93 = arith.constant 5.000000e-01 : f32
    %340 = vector.broadcast %cst_93 : f32 to vector<8x128xf32>
    %341 = arith.mulf %340, %339 : vector<8x128xf32>
    %cst_94 = arith.constant 5.000000e-01 : f32
    %342 = vector.broadcast %cst_94 : f32 to vector<8x128xf32>
    %343 = arith.addf %341, %342 : vector<8x128xf32>
    %344 = math.tanh %336 : vector<8x128xf32>
    %345 = vector.extract_strided_slice %343 {offsets = [0, 0], sizes = [8, 32], strides = [1, 1]} : vector<8x128xf32> to vector<8x32xf32>
    %346 = vector.extract_strided_slice %343 {offsets = [0, 32], sizes = [8, 32], strides = [1, 1]} : vector<8x128xf32> to vector<8x32xf32>
    %347 = vector.extract_strided_slice %344 {offsets = [0, 64], sizes = [8, 32], strides = [1, 1]} : vector<8x128xf32> to vector<8x32xf32>
    %348 = vector.extract_strided_slice %343 {offsets = [0, 96], sizes = [8, 32], strides = [1, 1]} : vector<8x128xf32> to vector<8x32xf32>
    %349 = arith.mulf %346, %305 : vector<8x32xf32>
    %350 = arith.mulf %345, %347 : vector<8x32xf32>
    %351 = arith.addf %349, %350 : vector<8x32xf32>
    %352 = math.tanh %351 : vector<8x32xf32>
    %353 = arith.mulf %348, %352 : vector<8x32xf32>
    %354 = arith.truncf %353 : vector<8x32xf32> to vector<8x32xbf16>
    %cst_95 = arith.constant dense<0.000000e+00> : vector<8x128xf32>
    %355 = tpu.matmul %354, %1, %cst_95 {dimension_numbers = #tpu.dot_dimension_numbers<[1], [0], [0], [1], [0, 0, 1, 1], [], []>} : vector<8x32xbf16>, vector<32x128xbf16>, vector<8x128xf32> -> vector<8x128xf32>
    %356 = arith.addf %331, %355 : vector<8x128xf32>
    %357 = vector.broadcast %3 : vector<1x128xf32> to vector<8x128xf32>
    %358 = arith.addf %356, %357 : vector<8x128xf32>
    %cst_96 = arith.constant 5.000000e-01 : f32
    %359 = vector.broadcast %cst_96 : f32 to vector<8x128xf32>
    %360 = arith.mulf %359, %358 : vector<8x128xf32>
    %361 = math.tanh %360 : vector<8x128xf32>
    %cst_97 = arith.constant 5.000000e-01 : f32
    %362 = vector.broadcast %cst_97 : f32 to vector<8x128xf32>
    %363 = arith.mulf %362, %361 : vector<8x128xf32>
    %cst_98 = arith.constant 5.000000e-01 : f32
    %364 = vector.broadcast %cst_98 : f32 to vector<8x128xf32>
    %365 = arith.addf %363, %364 : vector<8x128xf32>
    %366 = math.tanh %358 : vector<8x128xf32>
    %367 = vector.extract_strided_slice %365 {offsets = [0, 0], sizes = [8, 32], strides = [1, 1]} : vector<8x128xf32> to vector<8x32xf32>
    %368 = vector.extract_strided_slice %365 {offsets = [0, 32], sizes = [8, 32], strides = [1, 1]} : vector<8x128xf32> to vector<8x32xf32>
    %369 = vector.extract_strided_slice %366 {offsets = [0, 64], sizes = [8, 32], strides = [1, 1]} : vector<8x128xf32> to vector<8x32xf32>
    %370 = vector.extract_strided_slice %365 {offsets = [0, 96], sizes = [8, 32], strides = [1, 1]} : vector<8x128xf32> to vector<8x32xf32>
    %371 = arith.mulf %368, %327 : vector<8x32xf32>
    %372 = arith.mulf %367, %369 : vector<8x32xf32>
    %373 = arith.addf %371, %372 : vector<8x32xf32>
    %374 = math.tanh %373 : vector<8x32xf32>
    %375 = arith.mulf %370, %374 : vector<8x32xf32>
    %c0_99 = arith.constant 0 : index
    %c0_100 = arith.constant 0 : index
    %376 = vector.load %arg6[%c0_99, %c0_100] : memref<32x128xf32, #tpu.memory_space<vmem>>, vector<32x128xf32>
    %cst_101 = arith.constant dense<0.000000e+00> : vector<8x128xf32>
    %377 = tpu.matmul %375, %376, %cst_101 {dimension_numbers = #tpu.dot_dimension_numbers<[1], [0], [0], [1], [0, 0, 1, 1], [], []>} : vector<8x32xf32>, vector<32x128xf32>, vector<8x128xf32> -> vector<8x128xf32>
    %c0_102 = arith.constant 0 : index
    %c0_103 = arith.constant 0 : index
    %378 = vector.load %arg7[%c0_102, %c0_103] : memref<1x128xf32, #tpu.memory_space<vmem>>, vector<1x128xf32>
    %379 = vector.broadcast %378 : vector<1x128xf32> to vector<8x128xf32>
    %380 = arith.addf %377, %379 : vector<8x128xf32>
    %c0_104 = arith.constant 0 : index
    %c0_105 = arith.constant 0 : index
    %381 = vector.load %arg8[%c0_104, %c0_105] : memref<8x128xf32, #tpu.memory_space<vmem>>, vector<8x128xf32>
    tpu.vector_store %arg8[%c0_104, %c0_105], %380 {strides = array<i32>} : memref<8x128xf32, #tpu.memory_space<vmem>>, vector<8x128xf32>,
    return
  }
  func.func @transform_0(%arg0: i32) -> (i32, i32, i32) {
    %c0_i32 = arith.constant 0 : i32
    %c0_i32_0 = arith.constant 0 : i32
    %c0_i32_1 = arith.constant 0 : i32
    return %c0_i32, %arg0, %c0_i32_0 : i32, i32, i32
  }
  func.func @transform_1(%arg0: i32) -> (i32, i32) {
    %c0_i32 = arith.constant 0 : i32
    %c0_i32_0 = arith.constant 0 : i32
    %c0_i32_1 = arith.constant 0 : i32
    return %c0_i32, %c0_i32_0 : i32, i32
  }
  func.func @transform_2(%arg0: i32) -> (i32, i32) {
    %c0_i32 = arith.constant 0 : i32
    %c0_i32_0 = arith.constant 0 : i32
    %c0_i32_1 = arith.constant 0 : i32
    return %c0_i32, %c0_i32_0 : i32, i32
  }
  func.func @transform_3(%arg0: i32) -> (i32, i32) {
    %c0_i32 = arith.constant 0 : i32
    %c0_i32_0 = arith.constant 0 : i32
    %c0_i32_1 = arith.constant 0 : i32
    return %c0_i32, %c0_i32_0 : i32, i32
  }
  func.func @transform_4(%arg0: i32) -> (i32, i32) {
    %c0_i32 = arith.constant 0 : i32
    %c0_i32_0 = arith.constant 0 : i32
    %c0_i32_1 = arith.constant 0 : i32
    return %c0_i32, %c0_i32_0 : i32, i32
  }
  func.func @transform_5(%arg0: i32) -> (i32, i32) {
    %c0_i32 = arith.constant 0 : i32
    %c0_i32_0 = arith.constant 0 : i32
    %c0_i32_1 = arith.constant 0 : i32
    return %c0_i32, %c0_i32_0 : i32, i32
  }
  func.func @transform_6(%arg0: i32) -> (i32, i32) {
    %c0_i32 = arith.constant 0 : i32
    %c0_i32_0 = arith.constant 0 : i32
    %c0_i32_1 = arith.constant 0 : i32
    return %c0_i32, %c0_i32_0 : i32, i32
  }
  func.func @transform_7(%arg0: i32) -> (i32, i32) {
    %c0_i32 = arith.constant 0 : i32
    %c0_i32_0 = arith.constant 0 : i32
    return %arg0, %c0_i32 : i32, i32
  }
}

</mosaic_0001>

<bundles_post_ra>
// kernel: lstm_predictor_forward.1
= control target key start
LH: loop header
LB: loop body
LE: loop exit
PB: predicated region body
PF: predicated region fallthrough
CT: control target
= control target key end

     0   :  { %v2053_v0 = vmov 0.0   ;;  %vm2054_vm0 = vmmov 0   ;;  %v2055_v3 = vmov 0   ;;  %s2056_s30 = smov 64   ;;  %s2057_s8 = smov 32   ;;  %vm53_vm1 = vcmask 261120   ;;  %s2478_s1 = inlined_call_operand.vmem [shape: bf16[32,128], index: 1, kind: input, shape index: {}]   ;;  %s2479_s0 = inlined_call_operand.vmem [shape: f32[8,8,128], index: 0, kind: input, shape index: {}]   ;;  %s2480_s2 = inlined_call_operand.vmem [shape: bf16[32,128], index: 2, kind: input, shape index: {}]   ;;  %s2481_s3 = inlined_call_operand.vmem [shape: bf16[32,128], index: 3, kind: input, shape index: {}]   ;;  %s2482_s4 = inlined_call_operand.vmem [shape: f32[1,128], index: 4, kind: input, shape index: {}]   ;;  %s2483_s5 = inlined_call_operand.vmem [shape: f32[32,128], index: 5, kind: input, shape index: {}]   ;;  %s2484_s6 = inlined_call_operand.vmem [shape: f32[1,128], index: 6, kind: input, shape index: {}]   ;;  %s2485_s7 = inlined_call_operand.vmem [shape: f32[8,128], index: 7, kind: output, shape index: {}]  }
   0x1   :  { %1740 = vmatprep.subr.bf16.mxu0 %v2053_v0  ;;  %v2102_v1 = vld [vmem:[%s2478_s1 + $0x8] sm:$0xff]   ;;  %1744 = vmatprep.mubr.msk.bf16.mxu0 %vm2054_vm0, %v2053_v0  ;;  %v2113_v2 = vld [vmem:[%s2478_s1] sm:$0xff]  }
   0x2   :  { %1748 = vmatprep.subr.bf16.mxu1 %v2053_v0  ;;  %1752 = vmatprep.mubr.msk.bf16.mxu1 %vm2054_vm0, %v2053_v0  ;;  %v40_v4 = vld [vmem:[%s2479_s0] sm:$0xff]  ;;  %v2131_v20 = vld [vmem:[%s2480_s2 + $0x8] sm:$0xff]  }
   0x3   :  { %1741 = vmatpush3.bf16.msra.mxu0 %v2102_v1  ;;  %v2136_v21 = vld [vmem:[%s2481_s3 + $0x8] sm:$0xff]   ;;  %1749 = vmatpush3.bf16.msra.mxu1 %v2131_v20  ;;  %v2142_v22 = vld [vmem:[%s2480_s2] sm:$0xff]  }
   0x4   :  { %1742 = vmatprep.subr.bf16.mxu0 %v2053_v0  ;;  %1750 = vmatprep.subr.bf16.mxu1 %v2053_v0  ;;  %v2149_v23 = vld [vmem:[%s2481_s3] sm:$0xff]   ;;  %v1633_v40 = vld [vmem:[%s2479_s0 + $0x8] sm:$0xff] }
   0x5   :  { %v2181_v34 = vld [vmem:[%s2482_s4] ss:$0 sm:$0xff] }
   0x7   :  { %1743 = vmatpush3.bf16.msra.mxu0 %v2113_v2  ;;  %1751 = vmatpush3.bf16.msra.mxu1 %v2142_v22 }
   0x8   :  { %1756 = vmatprep.subr.bf16.mxu0 %v2053_v0  ;;  %1764 = vmatprep.subr.bf16.mxu1 %v2053_v0 }
   0xa   :  { %1745 = vmatmul.mubr.bf16.vlgmr.msra.gmra.mxu0 %v2055_v3 }
   0xb   :  { %1760 = vmatprep.mubr.msk.bf16.mxu0 %vm2054_vm0, %v2053_v0  ;;  %1757 = vmatpush3.bf16.msra.mxu0 %v2136_v21 }
   0xc   :  { %1758 = vmatprep.subr.bf16.mxu0 %v2053_v0 }
   0xf   :  { %1759 = vmatpush3.bf16.msra.mxu0 %v2149_v23 }
  0x10   :  { %1772 = vmatprep.subr.bf16.mxu0 %v2053_v0 }
  0x12   :  { %1761 = vmatmul.mubr.bf16.vlgmr.msra.gmra.mxu0 %v2055_v3 }
  0x13   :  { %1773 = vmatpush3.bf16.msra.mxu0 %v2131_v20  ;;  %1776 = vmatprep.mubr.msk.bf16.mxu0 %vm2054_vm0, %v2053_v0 }
  0x14   :  { %1774 = vmatprep.subr.bf16.mxu0 %v2053_v0 }
  0x17   :  { %1775 = vmatpush3.bf16.msra.mxu0 %v2142_v22 }
  0x18   :  { %1788 = vmatprep.subr.bf16.mxu0 %v2053_v0 }
  0xca   :  { %v91_v5 = vpop.f32.mrf.mxu0 }
  0xcb   :  { %v97_v6 = vadd.f32 %v91_v5, %v40_v4 }
  0xcc   :  { %v1746_v7 = vpop.f32.mrf.mxu0 }
  0xcd   :  { %1954 = vtanh.f32 %v97_v6  ;;  %v98_v11 = vmul.f32 0.5, %v97_v6 }
  0xce   :  { %v94_v8 = vpop.f32.mrf.mxu0 }
  0xcf   :  { %1956 = vtanh.f32 %v98_v11 }
  0xd0   :  { %v1747_v9 = vpop.f32.mrf.mxu0 }
  0xd2   :  { %v225_v29 = vpop.f32.mrf.mxu0 }
  0xd4   :  { %v1762_v30 = vpop.f32.mrf.mxu0 }
  0xd6   :  { %v228_v31 = vpop.f32.mrf.mxu0 }
  0xd8   :  { %v1763_v32 = vpop.f32.mrf.mxu0 }
  0xda   :  { %v1955_v10 = vpop.eup %1954 }
  0xdb   :  { %105 = vrot.lane.b32.xlu0 %v1955_v10, %s2056_s30 }
  0xdc   :  { %v1957_v12 = vpop.eup %1956 }
  0xdd   :  { %v100_v13 = vmul.f32 0.5, %v1957_v12 }
  0xdf   :  { %v101_v14 = vadd.f32 0.5, %v100_v13 }
  0xe1   :  { %v103_v17 = vmul.f32 0.0, %v101_v14 }
 0x14d   :  { %v106_v15 = vpop.permute.xlu0 %105 }
 0x14e   :  { %v108_v16 = vmul.f32 %v106_v15, %v101_v14 }
 0x150   :  { %110 = vrot.lane.b32.xlu0 %v108_v16, %s2057_s8 }
 0x1c2   :  { %v111_v18 = vpop.permute.xlu0 %110 }
 0x1c3   :  { %v2125_v19 = vadd.f32 %v111_v18, %v103_v17 }
 0x1c5   :  { %1958 = vtanh.f32 %v2125_v19 }
 0x1d2   :  { %v1959_v24 = vpop.eup %1958 }
 0x1d3   :  { %116 = vrot.lane.b32.xlu1 %v1959_v24, %s2056_s30 }
 0x245   :  { %v117_v25 = vpop.permute.xlu1 %116 }
 0x246   :  { %v119_v26 = vmul.f32 %v117_v25, %v101_v14 }
 0x248   :  { %v120_v27 = vpack.c.bf16 %v119_v26, %v119_v26 }
 0x24a   :  { %122 = vrot.lane.b32.xlu1 %v120_v27, %s2057_s8 }
 0x2bc   :  { %v123_v28 = vpop.permute.xlu1 %122 }
 0x2bd   :  { %1753 = vmatmul.mubr.msk.bf16.vlgmr.msra.gmra.mxu1 %vm53_vm1, %v123_v28 }
 0x2be   :  { %1765 = vmatpush3.bf16.msra.mxu1 %v2102_v1  ;;  %1768 = vmatprep.mubr.msk.bf16.mxu1 %vm2054_vm0, %v2053_v0 }
 0x2bf   :  { %1766 = vmatprep.subr.bf16.mxu1 %v2053_v0 }
 0x2c2   :  { %1767 = vmatpush3.bf16.msra.mxu1 %v2113_v2 }
 0x2c3   :  { %1780 = vmatprep.subr.bf16.mxu1 %v2053_v0 }
 0x2c5   :  { %1769 = vmatmul.mubr.msk.bf16.vlgmr.msra.gmra.mxu1 %vm53_vm1, %v123_v28 }
 0x2c6   :  { %1781 = vmatpush3.bf16.msra.mxu1 %v2136_v21  ;;  %1784 = vmatprep.mubr.msk.bf16.mxu1 %vm2054_vm0, %v2053_v0 }
 0x2c7   :  { %1782 = vmatprep.subr.bf16.mxu1 %v2053_v0 }
 0x2ca   :  { %1783 = vmatpush3.bf16.msra.mxu1 %v2149_v23 }
 0x2cb   :  { %1796 = vmatprep.subr.bf16.mxu1 %v2053_v0 }
 0x37d   :  { %v173_v33 = vpop.f32.mrf.mxu1 }
 0x37e   :  { %v226_v35 = vadd.f32 %v225_v29, %v173_v33  ;;  %v1637_v29 = vld [vmem:[%s2479_s0 + $0x10] sm:$0xff] }
 0x37f   :  { %v1754_v36 = vpop.f32.mrf.mxu1 }
 0x380   :  { %v237_v37 = vadd.f32 %v2181_v34, %v226_v35 }
 0x381   :  { %v176_v38 = vpop.f32.mrf.mxu1 }
 0x382   :  { %1960 = vtanh.f32 %v237_v37  ;;  %v238_v48 = vmul.f32 0.5, %v237_v37 }
 0x383   :  { %v1755_v39 = vpop.f32.mrf.mxu1 }
 0x385   :  { %v297_v41 = vpop.f32.mrf.mxu1 }
 0x386   :  { %v303_v42 = vadd.f32 %v1633_v40, %v297_v41 }
 0x387   :  { %v1770_v43 = vpop.f32.mrf.mxu1 }
 0x388   :  { %1962 = vtanh.f32 %v303_v42  ;;  %v304_v49 = vmul.f32 0.5, %v303_v42 }
 0x389   :  { %v300_v44 = vpop.f32.mrf.mxu1  ;;  %1964 = vtanh.f32 %v238_v48 }
 0x38a   :  { %1966 = vtanh.f32 %v304_v49 }
 0x38b   :  { %v1771_v45 = vpop.f32.mrf.mxu1 }
 0x38f   :  { %v1961_v46 = vpop.eup %1960 }
 0x390   :  { %245 = vrot.lane.b32.xlu1 %v1961_v46, %s2056_s30 }
 0x395   :  { %v1963_v47 = vpop.eup %1962 }
 0x396   :  { %311 = vrot.lane.b32.xlu0 %v1963_v47, %s2056_s30  ;;  %v1965_v50 = vpop.eup %1964 }
 0x397   :  { %v240_v51 = vmul.f32 0.5, %v1965_v50  ;;  %v1967_v52 = vpop.eup %1966 }
 0x398   :  { %v306_v56 = vmul.f32 0.5, %v1967_v52 }
 0x399   :  { %v241_v53 = vadd.f32 0.5, %v240_v51 }
 0x39a   :  { %v307_v57 = vadd.f32 0.5, %v306_v56 }
 0x39b   :  { %v243_v60 = vmul.f32 0.0, %v241_v53 }
 0x39c   :  { %v309_v63 = vmul.f32 %v307_v57, %v2125_v19 }
 0x402   :  { %v246_v54 = vpop.permute.xlu1 %245 }
 0x403   :  { %v248_v55 = vmul.f32 %v246_v54, %v241_v53 }
 0x405   :  { %250 = vrot.lane.b32.xlu1 %v248_v55, %s2057_s8 }
 0x408   :  { %v312_v58 = vpop.permute.xlu0 %311 }
 0x409   :  { %v314_v59 = vmul.f32 %v312_v58, %v307_v57 }
 0x40b   :  { %316 = vrot.lane.b32.xlu0 %v314_v59, %s2057_s8 }
 0x477   :  { %v251_v61 = vpop.permute.xlu1 %250 }
 0x478   :  { %v2191_v62 = vadd.f32 %v251_v61, %v243_v60 }
 0x47a   :  { %1968 = vtanh.f32 %v2191_v62 }
 0x47d   :  { %v317_v3 = vpop.permute.xlu0 %316 }
 0x47e   :  { %v2195_v4 = vadd.f32 %v317_v3, %v309_v63 }
 0x480   :  { %1970 = vtanh.f32 %v2195_v4 }
 0x487   :  { %v1969_v5 = vpop.eup %1968 }
 0x488   :  { %256 = vrot.lane.b32.xlu1 %v1969_v5, %s2056_s30 }
 0x48d   :  { %v1971_v6 = vpop.eup %1970 }
 0x48e   :  { %322 = vrot.lane.b32.xlu0 %v1971_v6, %s2056_s30 }
 0x4fa   :  { %v257_v7 = vpop.permute.xlu1 %256 }
 0x4fb   :  { %v259_v8 = vmul.f32 %v257_v7, %v241_v53 }
 0x4fd   :  { %v260_v9 = vpack.c.bf16 %v259_v8, %v259_v8 }
 0x4ff   :  { %374 = vrot.lane.b32.xlu1 %v260_v9, %s2057_s8 }
 0x500   :  { %v323_v10 = vpop.permute.xlu0 %322 }
 0x501   :  { %v325_v11 = vmul.f32 %v323_v10, %v307_v57 }
 0x503   :  { %v326_v12 = vpack.c.bf16 %v325_v11, %v325_v11 }
 0x505   :  { %328 = vrot.lane.b32.xlu0 %v326_v12, %s2057_s8 }
 0x571   :  { %v375_v13 = vpop.permute.xlu1 %374 }
 0x572   :  { %1785 = vmatmul.mubr.msk.bf16.vlgmr.msra.gmra.mxu1 %vm53_vm1, %v375_v13 }
 0x573   :  { %1797 = vmatpush3.bf16.msra.mxu1 %v2131_v20  ;;  %1800 = vmatprep.mubr.msk.bf16.mxu1 %vm2054_vm0, %v2053_v0 }
 0x574   :  { %1798 = vmatprep.subr.bf16.mxu1 %v2053_v0 }
 0x577   :  { %v329_v14 = vpop.permute.xlu0 %328  ;;  %1799 = vmatpush3.bf16.msra.mxu1 %v2142_v22 }
 0x578   :  { %1777 = vmatmul.mubr.msk.bf16.vlgmr.msra.gmra.mxu0 %vm53_vm1, %v329_v14  ;;  %1812 = vmatprep.subr.bf16.mxu1 %v2053_v0 }
 0x579   :  { %1789 = vmatpush3.bf16.msra.mxu0 %v2102_v1  ;;  %1792 = vmatprep.mubr.msk.bf16.mxu0 %vm2054_vm0, %v2053_v0 }
 0x57a   :  { %1790 = vmatprep.subr.bf16.mxu0 %v2053_v0 }
 0x57d   :  { %1791 = vmatpush3.bf16.msra.mxu0 %v2113_v2 }
 0x57e   :  { %1804 = vmatprep.subr.bf16.mxu0 %v2053_v0 }
 0x580   :  { %1793 = vmatmul.mubr.msk.bf16.vlgmr.msra.gmra.mxu0 %vm53_vm1, %v329_v14 }
 0x581   :  { %1805 = vmatpush3.bf16.msra.mxu0 %v2136_v21  ;;  %1808 = vmatprep.mubr.msk.bf16.mxu0 %vm2054_vm0, %v2053_v0 }
 0x582   :  { %1806 = vmatprep.subr.bf16.mxu0 %v2053_v0 }
 0x585   :  { %1807 = vmatpush3.bf16.msra.mxu0 %v2149_v23 }
 0x586   :  { %1820 = vmatprep.subr.bf16.mxu0 %v2053_v0 }
 0x632   :  { %v413_v15 = vpop.f32.mrf.mxu1 }
 0x634   :  { %v1786_v16 = vpop.f32.mrf.mxu1 }
 0x636   :  { %v416_v17 = vpop.f32.mrf.mxu1 }
 0x638   :  { %v367_v18 = vpop.f32.mrf.mxu0  ;;  %v1787_v19 = vpop.f32.mrf.mxu1 }
 0x639   :  { %v414_v24 = vadd.f32 %v413_v15, %v367_v18  ;;  %v1641_v15 = vld [vmem:[%s2479_s0 + $0x18] sm:$0xff] }
 0x63a   :  { %v1778_v25 = vpop.f32.mrf.mxu0 }
 0x63b   :  { %v419_v26 = vadd.f32 %v2181_v34, %v414_v24 }
 0x63c   :  { %v370_v27 = vpop.f32.mrf.mxu0 }
 0x63d   :  { %1972 = vtanh.f32 %v419_v26  ;;  %v420_v38 = vmul.f32 0.5, %v419_v26 }
 0x63e   :  { %v1779_v28 = vpop.f32.mrf.mxu0 }
 0x640   :  { %v479_v30 = vpop.f32.mrf.mxu0 }
 0x641   :  { %v485_v31 = vadd.f32 %v1637_v29, %v479_v30 }
 0x642   :  { %v1794_v32 = vpop.f32.mrf.mxu0 }
 0x643   :  { %1974 = vtanh.f32 %v485_v31  ;;  %v486_v39 = vmul.f32 0.5, %v485_v31 }
 0x644   :  { %v482_v33 = vpop.f32.mrf.mxu0  ;;  %1976 = vtanh.f32 %v420_v38 }
 0x645   :  { %1978 = vtanh.f32 %v486_v39 }
 0x646   :  { %v1795_v35 = vpop.f32.mrf.mxu0 }
 0x64a   :  { %v1973_v36 = vpop.eup %1972 }
 0x64b   :  { %427 = vrot.lane.b32.xlu1 %v1973_v36, %s2056_s30 }
 0x650   :  { %v1975_v37 = vpop.eup %1974 }
 0x651   :  { %493 = vrot.lane.b32.xlu0 %v1975_v37, %s2056_s30  ;;  %v1977_v40 = vpop.eup %1976 }
 0x652   :  { %v422_v41 = vmul.f32 0.5, %v1977_v40  ;;  %v1979_v42 = vpop.eup %1978 }
 0x653   :  { %v488_v46 = vmul.f32 0.5, %v1979_v42 }
 0x654   :  { %v423_v43 = vadd.f32 0.5, %v422_v41 }
 0x655   :  { %v489_v47 = vadd.f32 0.5, %v488_v46 }
 0x656   :  { %v425_v50 = vmul.f32 %v423_v43, %v2191_v62 }
 0x657   :  { %v491_v53 = vmul.f32 %v489_v47, %v2195_v4 }
 0x6bd   :  { %v428_v44 = vpop.permute.xlu1 %427 }
 0x6be   :  { %v430_v45 = vmul.f32 %v428_v44, %v423_v43 }
 0x6c0   :  { %432 = vrot.lane.b32.xlu1 %v430_v45, %s2057_s8 }
 0x6c3   :  { %v494_v48 = vpop.permute.xlu0 %493 }
 0x6c4   :  { %v496_v49 = vmul.f32 %v494_v48, %v489_v47 }
 0x6c6   :  { %498 = vrot.lane.b32.xlu0 %v496_v49, %s2057_s8 }
 0x732   :  { %v433_v51 = vpop.permute.xlu1 %432 }
 0x733   :  { %v2232_v52 = vadd.f32 %v433_v51, %v425_v50 }
 0x735   :  { %1980 = vtanh.f32 %v2232_v52 }
 0x738   :  { %v499_v54 = vpop.permute.xlu0 %498 }
 0x739   :  { %v2236_v55 = vadd.f32 %v499_v54, %v491_v53 }
 0x73b   :  { %1982 = vtanh.f32 %v2236_v55 }
 0x742   :  { %v1981_v56 = vpop.eup %1980 }
 0x743   :  { %438 = vrot.lane.b32.xlu1 %v1981_v56, %s2056_s30 }
 0x748   :  { %v1983_v57 = vpop.eup %1982 }
 0x749   :  { %504 = vrot.lane.b32.xlu0 %v1983_v57, %s2056_s30 }
 0x7b5   :  { %v439_v58 = vpop.permute.xlu1 %438 }
 0x7b6   :  { %v441_v59 = vmul.f32 %v439_v58, %v423_v43 }
 0x7b8   :  { %v442_v60 = vpack.c.bf16 %v441_v59, %v441_v59 }
 0x7ba   :  { %556 = vrot.lane.b32.xlu1 %v442_v60, %s2057_s8 }
 0x7bb   :  { %v505_v61 = vpop.permute.xlu0 %504 }
 0x7bc   :  { %v507_v62 = vmul.f32 %v505_v61, %v489_v47 }
 0x7be   :  { %v508_v63 = vpack.c.bf16 %v507_v62, %v507_v62 }
 0x7c0   :  { %510 = vrot.lane.b32.xlu0 %v508_v63, %s2057_s8 }
 0x82c   :  { %v557_v3 = vpop.permute.xlu1 %556 }
 0x82d   :  { %1809 = vmatmul.mubr.msk.bf16.vlgmr.msra.gmra.mxu0 %vm53_vm1, %v557_v3 }
 0x82e   :  { %1821 = vmatpush3.bf16.msra.mxu0 %v2131_v20  ;;  %1824 = vmatprep.mubr.msk.bf16.mxu0 %vm2054_vm0, %v2053_v0 }
 0x82f   :  { %1822 = vmatprep.subr.bf16.mxu0 %v2053_v0 }
 0x832   :  { %v511_v4 = vpop.permute.xlu0 %510  ;;  %1823 = vmatpush3.bf16.msra.mxu0 %v2142_v22 }
 0x833   :  { %1801 = vmatmul.mubr.msk.bf16.vlgmr.msra.gmra.mxu1 %vm53_vm1, %v511_v4  ;;  %1836 = vmatprep.subr.bf16.mxu0 %v2053_v0 }
 0x834   :  { %1813 = vmatpush3.bf16.msra.mxu1 %v2102_v1  ;;  %1816 = vmatprep.mubr.msk.bf16.mxu1 %vm2054_vm0, %v2053_v0 }
 0x835   :  { %1814 = vmatprep.subr.bf16.mxu1 %v2053_v0 }
 0x838   :  { %1815 = vmatpush3.bf16.msra.mxu1 %v2113_v2 }
 0x839   :  { %1828 = vmatprep.subr.bf16.mxu1 %v2053_v0 }
 0x83b   :  { %1817 = vmatmul.mubr.msk.bf16.vlgmr.msra.gmra.mxu1 %vm53_vm1, %v511_v4 }
 0x83c   :  { %1829 = vmatpush3.bf16.msra.mxu1 %v2136_v21  ;;  %1832 = vmatprep.mubr.msk.bf16.mxu1 %vm2054_vm0, %v2053_v0 }
 0x83d   :  { %1830 = vmatprep.subr.bf16.mxu1 %v2053_v0 }
 0x840   :  { %1831 = vmatpush3.bf16.msra.mxu1 %v2149_v23 }
 0x841   :  { %1844 = vmatprep.subr.bf16.mxu1 %v2053_v0 }
 0x8ed   :  { %v595_v5 = vpop.f32.mrf.mxu0 }
 0x8ef   :  { %v1810_v6 = vpop.f32.mrf.mxu0 }
 0x8f1   :  { %v598_v7 = vpop.f32.mrf.mxu0 }
 0x8f3   :  { %v549_v8 = vpop.f32.mrf.mxu1  ;;  %v1811_v9 = vpop.f32.mrf.mxu0 }
 0x8f4   :  { %v596_v10 = vadd.f32 %v595_v5, %v549_v8  ;;  %v1645_v5 = vld [vmem:[%s2479_s0 + $0x20] sm:$0xff] }
 0x8f5   :  { %v1802_v11 = vpop.f32.mrf.mxu1 }
 0x8f6   :  { %v601_v12 = vadd.f32 %v2181_v34, %v596_v10 }
 0x8f7   :  { %v552_v13 = vpop.f32.mrf.mxu1 }
 0x8f8   :  { %1984 = vtanh.f32 %v601_v12  ;;  %v602_v27 = vmul.f32 0.5, %v601_v12 }
 0x8f9   :  { %v1803_v14 = vpop.f32.mrf.mxu1 }
 0x8fb   :  { %v661_v16 = vpop.f32.mrf.mxu1 }
 0x8fc   :  { %v667_v17 = vadd.f32 %v1641_v15, %v661_v16 }
 0x8fd   :  { %v1818_v18 = vpop.f32.mrf.mxu1 }
 0x8fe   :  { %1986 = vtanh.f32 %v667_v17  ;;  %v668_v28 = vmul.f32 0.5, %v667_v17 }
 0x8ff   :  { %v664_v19 = vpop.f32.mrf.mxu1  ;;  %1988 = vtanh.f32 %v602_v27 }
 0x900   :  { %1990 = vtanh.f32 %v668_v28 }
 0x901   :  { %v1819_v24 = vpop.f32.mrf.mxu1 }
 0x905   :  { %v1985_v25 = vpop.eup %1984 }
 0x906   :  { %609 = vrot.lane.b32.xlu1 %v1985_v25, %s2056_s30 }
 0x90b   :  { %v1987_v26 = vpop.eup %1986 }
 0x90c   :  { %675 = vrot.lane.b32.xlu0 %v1987_v26, %s2056_s30  ;;  %v1989_v29 = vpop.eup %1988 }
 0x90d   :  { %v604_v30 = vmul.f32 0.5, %v1989_v29  ;;  %v1991_v31 = vpop.eup %1990 }
 0x90e   :  { %v670_v36 = vmul.f32 0.5, %v1991_v31 }
 0x90f   :  { %v605_v32 = vadd.f32 0.5, %v604_v30 }
 0x910   :  { %v671_v37 = vadd.f32 0.5, %v670_v36 }
 0x911   :  { %v607_v40 = vmul.f32 %v605_v32, %v2232_v52 }
 0x912   :  { %v673_v43 = vmul.f32 %v671_v37, %v2236_v55 }
 0x978   :  { %v610_v33 = vpop.permute.xlu1 %609 }
 0x979   :  { %v612_v35 = vmul.f32 %v610_v33, %v605_v32 }
 0x97b   :  { %614 = vrot.lane.b32.xlu1 %v612_v35, %s2057_s8 }
 0x97e   :  { %v676_v38 = vpop.permute.xlu0 %675 }
 0x97f   :  { %v678_v39 = vmul.f32 %v676_v38, %v671_v37 }
 0x981   :  { %680 = vrot.lane.b32.xlu0 %v678_v39, %s2057_s8 }
 0x9ed   :  { %v615_v41 = vpop.permute.xlu1 %614 }
 0x9ee   :  { %v2273_v42 = vadd.f32 %v615_v41, %v607_v40 }
 0x9f0   :  { %1992 = vtanh.f32 %v2273_v42 }
 0x9f3   :  { %v681_v44 = vpop.permute.xlu0 %680 }
 0x9f4   :  { %v2277_v45 = vadd.f32 %v681_v44, %v673_v43 }
 0x9f6   :  { %1994 = vtanh.f32 %v2277_v45 }
 0x9fd   :  { %v1993_v46 = vpop.eup %1992 }
 0x9fe   :  { %620 = vrot.lane.b32.xlu1 %v1993_v46, %s2056_s30 }
 0xa03   :  { %v1995_v47 = vpop.eup %1994 }
 0xa04   :  { %686 = vrot.lane.b32.xlu0 %v1995_v47, %s2056_s30 }
 0xa70   :  { %v621_v48 = vpop.permute.xlu1 %620 }
 0xa71   :  { %v623_v49 = vmul.f32 %v621_v48, %v605_v32 }
 0xa73   :  { %v624_v50 = vpack.c.bf16 %v623_v49, %v623_v49 }
 0xa75   :  { %738 = vrot.lane.b32.xlu1 %v624_v50, %s2057_s8 }
 0xa76   :  { %v687_v51 = vpop.permute.xlu0 %686 }
 0xa77   :  { %v689_v52 = vmul.f32 %v687_v51, %v671_v37 }
 0xa79   :  { %v690_v53 = vpack.c.bf16 %v689_v52, %v689_v52 }
 0xa7b   :  { %692 = vrot.lane.b32.xlu0 %v690_v53, %s2057_s8 }
 0xae7   :  { %v739_v54 = vpop.permute.xlu1 %738 }
 0xae8   :  { %1833 = vmatmul.mubr.msk.bf16.vlgmr.msra.gmra.mxu1 %vm53_vm1, %v739_v54 }
 0xae9   :  { %1845 = vmatpush3.bf16.msra.mxu1 %v2131_v20  ;;  %1848 = vmatprep.mubr.msk.bf16.mxu1 %vm2054_vm0, %v2053_v0 }
 0xaea   :  { %1846 = vmatprep.subr.bf16.mxu1 %v2053_v0 }
 0xaed   :  { %v693_v55 = vpop.permute.xlu0 %692  ;;  %1847 = vmatpush3.bf16.msra.mxu1 %v2142_v22 }
 0xaee   :  { %1825 = vmatmul.mubr.msk.bf16.vlgmr.msra.gmra.mxu0 %vm53_vm1, %v693_v55  ;;  %1860 = vmatprep.subr.bf16.mxu1 %v2053_v0 }
 0xaef   :  { %1837 = vmatpush3.bf16.msra.mxu0 %v2102_v1  ;;  %1840 = vmatprep.mubr.msk.bf16.mxu0 %vm2054_vm0, %v2053_v0 }
 0xaf0   :  { %1838 = vmatprep.subr.bf16.mxu0 %v2053_v0 }
 0xaf3   :  { %1839 = vmatpush3.bf16.msra.mxu0 %v2113_v2 }
 0xaf4   :  { %1852 = vmatprep.subr.bf16.mxu0 %v2053_v0 }
 0xaf6   :  { %1841 = vmatmul.mubr.msk.bf16.vlgmr.msra.gmra.mxu0 %vm53_vm1, %v693_v55 }
 0xaf7   :  { %1853 = vmatpush3.bf16.msra.mxu0 %v2136_v21  ;;  %1856 = vmatprep.mubr.msk.bf16.mxu0 %vm2054_vm0, %v2053_v0 }
 0xaf8   :  { %1854 = vmatprep.subr.bf16.mxu0 %v2053_v0 }
 0xafb   :  { %1855 = vmatpush3.bf16.msra.mxu0 %v2149_v23 }
 0xafc   :  { %1868 = vmatprep.subr.bf16.mxu0 %v2053_v0 }
 0xba8   :  { %v777_v56 = vpop.f32.mrf.mxu1 }
 0xbaa   :  { %v1834_v57 = vpop.f32.mrf.mxu1 }
 0xbac   :  { %v780_v58 = vpop.f32.mrf.mxu1 }
 0xbae   :  { %v731_v59 = vpop.f32.mrf.mxu0  ;;  %v1835_v60 = vpop.f32.mrf.mxu1 }
 0xbaf   :  { %v778_v61 = vadd.f32 %v777_v56, %v731_v59  ;;  %v1649_v56 = vld [vmem:[%s2479_s0 + $0x28] sm:$0xff] }
 0xbb0   :  { %v1826_v62 = vpop.f32.mrf.mxu0 }
 0xbb1   :  { %v783_v63 = vadd.f32 %v2181_v34, %v778_v61 }
 0xbb2   :  { %v734_v3 = vpop.f32.mrf.mxu0 }
 0xbb3   :  { %1996 = vtanh.f32 %v783_v63  ;;  %v784_v13 = vmul.f32 0.5, %v783_v63 }
 0xbb4   :  { %v1827_v4 = vpop.f32.mrf.mxu0 }
 0xbb6   :  { %v843_v6 = vpop.f32.mrf.mxu0 }
 0xbb7   :  { %v849_v7 = vadd.f32 %v1645_v5, %v843_v6 }
 0xbb8   :  { %v1842_v8 = vpop.f32.mrf.mxu0 }
 0xbb9   :  { %1998 = vtanh.f32 %v849_v7  ;;  %v850_v14 = vmul.f32 0.5, %v849_v7 }
 0xbba   :  { %v846_v9 = vpop.f32.mrf.mxu0  ;;  %2000 = vtanh.f32 %v784_v13 }
 0xbbb   :  { %2002 = vtanh.f32 %v850_v14 }
 0xbbc   :  { %v1843_v10 = vpop.f32.mrf.mxu0 }
 0xbc0   :  { %v1997_v11 = vpop.eup %1996 }
 0xbc1   :  { %791 = vrot.lane.b32.xlu1 %v1997_v11, %s2056_s30 }
 0xbc6   :  { %v1999_v12 = vpop.eup %1998 }
 0xbc7   :  { %857 = vrot.lane.b32.xlu0 %v1999_v12, %s2056_s30  ;;  %v2001_v15 = vpop.eup %2000 }
 0xbc8   :  { %v786_v16 = vmul.f32 0.5, %v2001_v15  ;;  %v2003_v17 = vpop.eup %2002 }
 0xbc9   :  { %v852_v25 = vmul.f32 0.5, %v2003_v17 }
 0xbca   :  { %v787_v18 = vadd.f32 0.5, %v786_v16 }
 0xbcb   :  { %v853_v26 = vadd.f32 0.5, %v852_v25 }
 0xbcc   :  { %v789_v29 = vmul.f32 %v787_v18, %v2273_v42 }
 0xbcd   :  { %v855_v32 = vmul.f32 %v853_v26, %v2277_v45 }
 0xc33   :  { %v792_v19 = vpop.permute.xlu1 %791 }
 0xc34   :  { %v794_v24 = vmul.f32 %v792_v19, %v787_v18 }
 0xc36   :  { %796 = vrot.lane.b32.xlu1 %v794_v24, %s2057_s8 }
 0xc39   :  { %v858_v27 = vpop.permute.xlu0 %857 }
 0xc3a   :  { %v860_v28 = vmul.f32 %v858_v27, %v853_v26 }
 0xc3c   :  { %862 = vrot.lane.b32.xlu0 %v860_v28, %s2057_s8 }
 0xca8   :  { %v797_v30 = vpop.permute.xlu1 %796 }
 0xca9   :  { %v2314_v31 = vadd.f32 %v797_v30, %v789_v29 }
 0xcab   :  { %2004 = vtanh.f32 %v2314_v31 }
 0xcae   :  { %v863_v33 = vpop.permute.xlu0 %862 }
 0xcaf   :  { %v2318_v35 = vadd.f32 %v863_v33, %v855_v32 }
 0xcb1   :  { %2006 = vtanh.f32 %v2318_v35 }
 0xcb8   :  { %v2005_v36 = vpop.eup %2004 }
 0xcb9   :  { %802 = vrot.lane.b32.xlu1 %v2005_v36, %s2056_s30 }
 0xcbe   :  { %v2007_v37 = vpop.eup %2006 }
 0xcbf   :  { %868 = vrot.lane.b32.xlu0 %v2007_v37, %s2056_s30 }
 0xd2b   :  { %v803_v38 = vpop.permute.xlu1 %802 }
 0xd2c   :  { %v805_v39 = vmul.f32 %v803_v38, %v787_v18 }
 0xd2e   :  { %v806_v40 = vpack.c.bf16 %v805_v39, %v805_v39 }
 0xd30   :  { %920 = vrot.lane.b32.xlu1 %v806_v40, %s2057_s8 }
 0xd31   :  { %v869_v41 = vpop.permute.xlu0 %868 }
 0xd32   :  { %v871_v42 = vmul.f32 %v869_v41, %v853_v26 }
 0xd34   :  { %v872_v43 = vpack.c.bf16 %v871_v42, %v871_v42 }
 0xd36   :  { %874 = vrot.lane.b32.xlu0 %v872_v43, %s2057_s8 }
 0xda2   :  { %v921_v44 = vpop.permute.xlu1 %920 }
 0xda3   :  { %1857 = vmatmul.mubr.msk.bf16.vlgmr.msra.gmra.mxu0 %vm53_vm1, %v921_v44  ;;  %v1653_v44 = vld [vmem:[%s2479_s0 + $0x30] sm:$0xff] }
 0xda4   :  { %1869 = vmatpush3.bf16.msra.mxu0 %v2131_v20  ;;  %1872 = vmatprep.mubr.msk.bf16.mxu0 %vm2054_vm0, %v2053_v0 }
 0xda5   :  { %1870 = vmatprep.subr.bf16.mxu0 %v2053_v0 }
 0xda8   :  { %v875_v45 = vpop.permute.xlu0 %874  ;;  %1871 = vmatpush3.bf16.msra.mxu0 %v2142_v22 }
 0xda9   :  { %1849 = vmatmul.mubr.msk.bf16.vlgmr.msra.gmra.mxu1 %vm53_vm1, %v875_v45  ;;  %1884 = vmatprep.subr.bf16.mxu0 %v2053_v0 }
 0xdaa   :  { %1861 = vmatpush3.bf16.msra.mxu1 %v2102_v1  ;;  %1864 = vmatprep.mubr.msk.bf16.mxu1 %vm2054_vm0, %v2053_v0 }
 0xdab   :  { %1862 = vmatprep.subr.bf16.mxu1 %v2053_v0 }
 0xdae   :  { %1863 = vmatpush3.bf16.msra.mxu1 %v2113_v2 }
 0xdaf   :  { %1876 = vmatprep.subr.bf16.mxu1 %v2053_v0 }
 0xdb1   :  { %1865 = vmatmul.mubr.msk.bf16.vlgmr.msra.gmra.mxu1 %vm53_vm1, %v875_v45 }
 0xdb2   :  { %1877 = vmatpush3.bf16.msra.mxu1 %v2136_v21  ;;  %1880 = vmatprep.mubr.msk.bf16.mxu1 %vm2054_vm0, %v2053_v0 }
 0xdb3   :  { %1878 = vmatprep.subr.bf16.mxu1 %v2053_v0 }
 0xdb6   :  { %1879 = vmatpush3.bf16.msra.mxu1 %v2149_v23 }
 0xdb7   :  { %1892 = vmatprep.subr.bf16.mxu1 %v2053_v0 }
 0xe63   :  { %v959_v46 = vpop.f32.mrf.mxu0 }
 0xe65   :  { %v1858_v47 = vpop.f32.mrf.mxu0 }
 0xe67   :  { %v962_v48 = vpop.f32.mrf.mxu0 }
 0xe69   :  { %v913_v49 = vpop.f32.mrf.mxu1  ;;  %v1859_v50 = vpop.f32.mrf.mxu0 }
 0xe6a   :  { %v960_v51 = vadd.f32 %v959_v46, %v913_v49 }
 0xe6b   :  { %v1850_v52 = vpop.f32.mrf.mxu1 }
 0xe6c   :  { %v965_v53 = vadd.f32 %v2181_v34, %v960_v51 }
 0xe6d   :  { %v916_v54 = vpop.f32.mrf.mxu1 }
 0xe6e   :  { %2008 = vtanh.f32 %v965_v53  ;;  %v966_v3 = vmul.f32 0.5, %v965_v53 }
 0xe6f   :  { %v1851_v55 = vpop.f32.mrf.mxu1 }
 0xe71   :  { %v1025_v57 = vpop.f32.mrf.mxu1 }
 0xe72   :  { %v1031_v58 = vadd.f32 %v1649_v56, %v1025_v57 }
 0xe73   :  { %v1866_v59 = vpop.f32.mrf.mxu1 }
 0xe74   :  { %2010 = vtanh.f32 %v1031_v58  ;;  %v1032_v4 = vmul.f32 0.5, %v1031_v58 }
 0xe75   :  { %v1028_v60 = vpop.f32.mrf.mxu1  ;;  %2012 = vtanh.f32 %v966_v3 }
 0xe76   :  { %2014 = vtanh.f32 %v1032_v4 }
 0xe77   :  { %v1867_v61 = vpop.f32.mrf.mxu1 }
 0xe7b   :  { %v2009_v62 = vpop.eup %2008 }
 0xe7c   :  { %973 = vrot.lane.b32.xlu1 %v2009_v62, %s2056_s30 }
 0xe81   :  { %v2011_v63 = vpop.eup %2010 }
 0xe82   :  { %1039 = vrot.lane.b32.xlu0 %v2011_v63, %s2056_s30  ;;  %v2013_v5 = vpop.eup %2012 }
 0xe83   :  { %v968_v6 = vmul.f32 0.5, %v2013_v5  ;;  %v2015_v7 = vpop.eup %2014 }
 0xe84   :  { %v1034_v11 = vmul.f32 0.5, %v2015_v7 }
 0xe85   :  { %v969_v8 = vadd.f32 0.5, %v968_v6 }
 0xe86   :  { %v1035_v12 = vadd.f32 0.5, %v1034_v11 }
 0xe87   :  { %v971_v15 = vmul.f32 %v969_v8, %v2314_v31 }
 0xe88   :  { %v1037_v18 = vmul.f32 %v1035_v12, %v2318_v35 }
 0xeee   :  { %v974_v9 = vpop.permute.xlu1 %973 }
 0xeef   :  { %v976_v10 = vmul.f32 %v974_v9, %v969_v8 }
 0xef1   :  { %978 = vrot.lane.b32.xlu1 %v976_v10, %s2057_s8 }
 0xef4   :  { %v1040_v13 = vpop.permute.xlu0 %1039 }
 0xef5   :  { %v1042_v14 = vmul.f32 %v1040_v13, %v1035_v12 }
 0xef7   :  { %1044 = vrot.lane.b32.xlu0 %v1042_v14, %s2057_s8 }
 0xf63   :  { %v979_v16 = vpop.permute.xlu1 %978 }
 0xf64   :  { %v2355_v17 = vadd.f32 %v979_v16, %v971_v15 }
 0xf66   :  { %2016 = vtanh.f32 %v2355_v17 }
 0xf69   :  { %v1045_v19 = vpop.permute.xlu0 %1044 }
 0xf6a   :  { %v2359_v24 = vadd.f32 %v1045_v19, %v1037_v18  ;;  %v2050_v19 = vld [vmem:[%s2478_s1 + $0x8] sm:$0xff]  }
 0xf6c   :  { %2018 = vtanh.f32 %v2359_v24 }
 0xf73   :  { %v2017_v25 = vpop.eup %2016 }
 0xf74   :  { %984 = vrot.lane.b32.xlu1 %v2017_v25, %s2056_s30 }
 0xf79   :  { %v2019_v26 = vpop.eup %2018 }
 0xf7a   :  { %1050 = vrot.lane.b32.xlu0 %v2019_v26, %s2056_s30 }
 0xfe6   :  { %v985_v27 = vpop.permute.xlu1 %984 }
 0xfe7   :  { %v987_v28 = vmul.f32 %v985_v27, %v969_v8 }
 0xfe9   :  { %v988_v29 = vpack.c.bf16 %v987_v28, %v987_v28 }
 0xfeb   :  { %1102 = vrot.lane.b32.xlu1 %v988_v29, %s2057_s8 }
 0xfec   :  { %v1051_v30 = vpop.permute.xlu0 %1050 }
 0xfed   :  { %v1053_v31 = vmul.f32 %v1051_v30, %v1035_v12 }
 0xfef   :  { %v1054_v32 = vpack.c.bf16 %v1053_v31, %v1053_v31 }
 0xff1   :  { %1056 = vrot.lane.b32.xlu0 %v1054_v32, %s2057_s8 }
0x105d   :  { %v1103_v33 = vpop.permute.xlu1 %1102 }
0x105e   :  { %1881 = vmatmul.mubr.msk.bf16.vlgmr.msra.gmra.mxu1 %vm53_vm1, %v1103_v33 }
0x105f   :  { %1893 = vmatpush3.bf16.msra.mxu1 %v2131_v20  ;;  %1896 = vmatprep.mubr.msk.bf16.mxu1 %vm2054_vm0, %v2053_v0 }
0x1060   :  { %1894 = vmatprep.subr.bf16.mxu1 %v2053_v0 }
0x1063   :  { %v1057_v35 = vpop.permute.xlu0 %1056  ;;  %1895 = vmatpush3.bf16.msra.mxu1 %v2142_v22 }
0x1064   :  { %1873 = vmatmul.mubr.msk.bf16.vlgmr.msra.gmra.mxu0 %vm53_vm1, %v1057_v35  ;;  %1908 = vmatprep.subr.bf16.mxu1 %v2053_v0 }
0x1065   :  { %1885 = vmatpush3.bf16.msra.mxu0 %v2102_v1  ;;  %1888 = vmatprep.mubr.msk.bf16.mxu0 %vm2054_vm0, %v2053_v0 }
0x1066   :  { %1886 = vmatprep.subr.bf16.mxu0 %v2053_v0 }
0x1069   :  { %1887 = vmatpush3.bf16.msra.mxu0 %v2113_v2 }
0x106a   :  { %1900 = vmatprep.subr.bf16.mxu0 %v2053_v0 }
0x106c   :  { %1889 = vmatmul.mubr.msk.bf16.vlgmr.msra.gmra.mxu0 %vm53_vm1, %v1057_v35 }
0x106d   :  { %1901 = vmatpush3.bf16.msra.mxu0 %v2136_v21  ;;  %1904 = vmatprep.mubr.msk.bf16.mxu0 %vm2054_vm0, %v2053_v0 }
0x106e   :  { %1902 = vmatprep.subr.bf16.mxu0 %v2053_v0 }
0x1071   :  { %1903 = vmatpush3.bf16.msra.mxu0 %v2149_v23 }
0x1072   :  { %1916 = vmatprep.subr.bf16.mxu0 %v2053_v0 }
0x111e   :  { %v1141_v1 = vpop.f32.mrf.mxu1 }
0x1120   :  { %v1882_v36 = vpop.f32.mrf.mxu1 }
0x1122   :  { %v1144_v37 = vpop.f32.mrf.mxu1 }
0x1124   :  { %v1095_v38 = vpop.f32.mrf.mxu0  ;;  %v1883_v2 = vpop.f32.mrf.mxu1 }
0x1125   :  { %v1142_v39 = vadd.f32 %v1141_v1, %v1095_v38 }
0x1126   :  { %v1874_v40 = vpop.f32.mrf.mxu0 }
0x1127   :  { %v1147_v41 = vadd.f32 %v2181_v34, %v1142_v39 }
0x1128   :  { %v1098_v42 = vpop.f32.mrf.mxu0 }
0x1129   :  { %2020 = vtanh.f32 %v1147_v41  ;;  %v1148_v52 = vmul.f32 0.5, %v1147_v41 }
0x112a   :  { %v1875_v43 = vpop.f32.mrf.mxu0 }
0x112c   :  { %v1207_v45 = vpop.f32.mrf.mxu0 }
0x112d   :  { %v1213_v46 = vadd.f32 %v1653_v44, %v1207_v45 }
0x112e   :  { %v1890_v47 = vpop.f32.mrf.mxu0 }
0x112f   :  { %2022 = vtanh.f32 %v1213_v46  ;;  %v1214_v53 = vmul.f32 0.5, %v1213_v46 }
0x1130   :  { %v1210_v48 = vpop.f32.mrf.mxu0  ;;  %2024 = vtanh.f32 %v1148_v52 }
0x1131   :  { %2026 = vtanh.f32 %v1214_v53 }
0x1132   :  { %v1891_v49 = vpop.f32.mrf.mxu0 }
0x1136   :  { %v2021_v50 = vpop.eup %2020 }
0x1137   :  { %1155 = vrot.lane.b32.xlu1 %v2021_v50, %s2056_s30 }
0x113c   :  { %v2023_v51 = vpop.eup %2022 }
0x113d   :  { %1221 = vrot.lane.b32.xlu0 %v2023_v51, %s2056_s30  ;;  %v2025_v54 = vpop.eup %2024 }
0x113e   :  { %v1150_v55 = vmul.f32 0.5, %v2025_v54  ;;  %v2027_v56 = vpop.eup %2026 }
0x113f   :  { %v1216_v60 = vmul.f32 0.5, %v2027_v56 }
0x1140   :  { %v1151_v57 = vadd.f32 0.5, %v1150_v55 }
0x1141   :  { %v1217_v61 = vadd.f32 0.5, %v1216_v60 }
0x1142   :  { %v1153_v3 = vmul.f32 %v1151_v57, %v2355_v17 }
0x1143   :  { %v1219_v6 = vmul.f32 %v1217_v61, %v2359_v24 }
0x11a9   :  { %v1156_v58 = vpop.permute.xlu1 %1155 }
0x11aa   :  { %v1158_v59 = vmul.f32 %v1156_v58, %v1151_v57 }
0x11ac   :  { %1160 = vrot.lane.b32.xlu1 %v1158_v59, %s2057_s8 }
0x11af   :  { %v1222_v62 = vpop.permute.xlu0 %1221 }
0x11b0   :  { %v1224_v63 = vmul.f32 %v1222_v62, %v1217_v61 }
0x11b2   :  { %1226 = vrot.lane.b32.xlu0 %v1224_v63, %s2057_s8 }
0x121e   :  { %v1161_v4 = vpop.permute.xlu1 %1160 }
0x121f   :  { %v2396_v5 = vadd.f32 %v1161_v4, %v1153_v3 }
0x1221   :  { %2028 = vtanh.f32 %v2396_v5 }
0x1224   :  { %v1227_v7 = vpop.permute.xlu0 %1226 }
0x1225   :  { %v2400_v8 = vadd.f32 %v1227_v7, %v1219_v6 }
0x1227   :  { %2030 = vtanh.f32 %v2400_v8 }
0x122e   :  { %v2029_v9 = vpop.eup %2028 }
0x122f   :  { %1166 = vrot.lane.b32.xlu1 %v2029_v9, %s2056_s30 }
0x1234   :  { %v2031_v10 = vpop.eup %2030 }
0x1235   :  { %1232 = vrot.lane.b32.xlu0 %v2031_v10, %s2056_s30 }
0x12a1   :  { %v1167_v11 = vpop.permute.xlu1 %1166 }
0x12a2   :  { %v1169_v12 = vmul.f32 %v1167_v11, %v1151_v57  ;;  %v2052_v11 = vld [vmem:[%s2482_s4] ss:$0 sm:$0xff] }
0x12a4   :  { %v1170_v13 = vpack.c.bf16 %v1169_v12, %v1169_v12 }
0x12a6   :  { %1284 = vrot.lane.b32.xlu1 %v1170_v13, %s2057_s8 }
0x12a7   :  { %v1233_v14 = vpop.permute.xlu0 %1232 }
0x12a8   :  { %v1235_v15 = vmul.f32 %v1233_v14, %v1217_v61 }
0x12aa   :  { %v1236_v16 = vpack.c.bf16 %v1235_v15, %v1235_v15 }
0x12ac   :  { %1238 = vrot.lane.b32.xlu0 %v1236_v16, %s2057_s8 }
0x1318   :  { %v1285_v17 = vpop.permute.xlu1 %1284 }
0x1319   :  { %1905 = vmatmul.mubr.msk.bf16.vlgmr.msra.gmra.mxu0 %vm53_vm1, %v1285_v17 }
0x131a   :  { %1917 = vmatpush3.bf16.msra.mxu0 %v2131_v20  ;;  %1920 = vmatprep.mubr.msk.bf16.mxu0 %vm2054_vm0, %v2053_v0  ;;  %v2051_v20 = vld [vmem:[%s2478_s1] sm:$0xff]  }
0x131b   :  { %1918 = vmatprep.subr.bf16.mxu0 %v2053_v0 }
0x131e   :  { %v1239_v18 = vpop.permute.xlu0 %1238  ;;  %1919 = vmatpush3.bf16.msra.mxu0 %v2142_v22 }
0x131f   :  { %1897 = vmatmul.mubr.msk.bf16.vlgmr.msra.gmra.mxu1 %vm53_vm1, %v1239_v18  ;;  %1932 = vmatprep.subr.mxu0 %v2053_v0 }
0x1320   :  { %1909 = vmatpush3.bf16.msra.mxu1 %v2050_v19  ;;  %1912 = vmatprep.mubr.msk.bf16.mxu1 %vm2054_vm0, %v2053_v0 }
0x1321   :  { %1910 = vmatprep.subr.bf16.mxu1 %v2053_v0 }
0x1324   :  { %1911 = vmatpush3.bf16.msra.mxu1 %v2051_v20 }
0x1325   :  { %1924 = vmatprep.subr.bf16.mxu1 %v2053_v0 }
0x1327   :  { %1913 = vmatmul.mubr.msk.bf16.vlgmr.msra.gmra.mxu1 %vm53_vm1, %v1239_v18 }
0x1328   :  { %1925 = vmatpush3.bf16.msra.mxu1 %v2136_v21  ;;  %1928 = vmatprep.mubr.msk.bf16.mxu1 %vm2054_vm0, %v2053_v0  ;;  %v1657_v21 = vld [vmem:[%s2479_s0 + $0x38] sm:$0xff] }
0x1329   :  { %1926 = vmatprep.subr.bf16.mxu1 %v2053_v0 }
0x132c   :  { %1927 = vmatpush3.bf16.msra.mxu1 %v2149_v23 }
0x13d9   :  { %v1323_v22 = vpop.f32.mrf.mxu0 }
0x13db   :  { %v1906_v24 = vpop.f32.mrf.mxu0 }
0x13dd   :  { %v1326_v25 = vpop.f32.mrf.mxu0 }
0x13df   :  { %v1277_v26 = vpop.f32.mrf.mxu1  ;;  %v1907_v27 = vpop.f32.mrf.mxu0 }
0x13e0   :  { %v1324_v28 = vadd.f32 %v1323_v22, %v1277_v26  ;;  %v1537_v27 = vld [vmem:[%s2483_s5 + $0x18] sm:$0xff] }
0x13e1   :  { %v1898_v29 = vpop.f32.mrf.mxu1 }
0x13e2   :  { %v1329_v30 = vadd.f32 %v2181_v34, %v1324_v28  ;;  %v1536_v28 = vld [vmem:[%s2483_s5 + $0x10] sm:$0xff]  ;;  %v1535_v29 = vld [vmem:[%s2483_s5 + $0x8] sm:$0xff] }
0x13e3   :  { %v1280_v31 = vpop.f32.mrf.mxu1 }
0x13e4   :  { %2032 = vtanh.f32 %v1329_v30  ;;  %v1330_v34 = vmul.f32 0.5, %v1329_v30  ;;  %v1534_v30 = vld [vmem:[%s2483_s5] sm:$0xff] }
0x13e5   :  { %v1899_v32 = vpop.f32.mrf.mxu1 }
0x13e7   :  { %v1389_v33 = vpop.f32.mrf.mxu1 }
0x13e8   :  { %v1395_v35 = vadd.f32 %v1657_v21, %v1389_v33 }
0x13e9   :  { %v1914_v1 = vpop.f32.mrf.mxu1 }
0x13ea   :  { %2034 = vtanh.f32 %v1395_v35  ;;  %v1396_v2 = vmul.f32 0.5, %v1395_v35  ;;  %v1661_v35 = vld [vmem:[%s2484_s6] ss:$0 sm:$0xff] }
0x13eb   :  { %v1392_v23 = vpop.f32.mrf.mxu1  ;;  %2036 = vtanh.f32 %v1330_v34 }
0x13ec   :  { %2038 = vtanh.f32 %v1396_v2 }
0x13ed   :  { %v1915_v36 = vpop.f32.mrf.mxu1 }
0x13f1   :  { %v2033_v37 = vpop.eup %2032 }
0x13f2   :  { %1337 = vrot.lane.b32.xlu0 %v2033_v37, %s2056_s30 }
0x13f7   :  { %v2035_v38 = vpop.eup %2034 }
0x13f8   :  { %1403 = vrot.lane.b32.xlu1 %v2035_v38, %s2056_s30  ;;  %v2037_v39 = vpop.eup %2036 }
0x13f9   :  { %v1332_v40 = vmul.f32 0.5, %v2037_v39  ;;  %v2039_v41 = vpop.eup %2038 }
0x13fa   :  { %v1398_v45 = vmul.f32 0.5, %v2039_v41 }
0x13fb   :  { %v1333_v42 = vadd.f32 0.5, %v1332_v40 }
0x13fc   :  { %v1399_v46 = vadd.f32 0.5, %v1398_v45 }
0x13fd   :  { %v1335_v49 = vmul.f32 %v1333_v42, %v2396_v5 }
0x13fe   :  { %v1401_v52 = vmul.f32 %v1399_v46, %v2400_v8 }
0x1464   :  { %v1338_v43 = vpop.permute.xlu0 %1337 }
0x1465   :  { %v1340_v44 = vmul.f32 %v1338_v43, %v1333_v42 }
0x1467   :  { %1342 = vrot.lane.b32.xlu0 %v1340_v44, %s2057_s8 }
0x146a   :  { %v1404_v47 = vpop.permute.xlu1 %1403 }
0x146b   :  { %v1406_v48 = vmul.f32 %v1404_v47, %v1399_v46 }
0x146d   :  { %1408 = vrot.lane.b32.xlu1 %v1406_v48, %s2057_s8 }
0x14d9   :  { %v1343_v50 = vpop.permute.xlu0 %1342 }
0x14da   :  { %v1345_v51 = vadd.f32 %v1343_v50, %v1335_v49 }
0x14dc   :  { %2040 = vtanh.f32 %v1345_v51 }
0x14df   :  { %v1409_v53 = vpop.permute.xlu1 %1408 }
0x14e0   :  { %v1411_v54 = vadd.f32 %v1409_v53, %v1401_v52 }
0x14e2   :  { %2042 = vtanh.f32 %v1411_v54 }
0x14e9   :  { %v2041_v55 = vpop.eup %2040 }
0x14ea   :  { %1348 = vrot.lane.b32.xlu0 %v2041_v55, %s2056_s30 }
0x14ef   :  { %v2043_v56 = vpop.eup %2042 }
0x14f0   :  { %1414 = vrot.lane.b32.xlu1 %v2043_v56, %s2056_s30 }
0x155c   :  { %v1349_v57 = vpop.permute.xlu0 %1348 }
0x155d   :  { %v1351_v58 = vmul.f32 %v1349_v57, %v1333_v42 }
0x155f   :  { %v1352_v59 = vpack.c.bf16 %v1351_v58, %v1351_v58 }
0x1561   :  { %1466 = vrot.lane.b32.xlu1 %v1352_v59, %s2057_s8 }
0x1562   :  { %v1415_v60 = vpop.permute.xlu1 %1414 }
0x1563   :  { %v1417_v61 = vmul.f32 %v1415_v60, %v1399_v46 }
0x1565   :  { %v1418_v62 = vpack.c.bf16 %v1417_v61, %v1417_v61 }
0x1567   :  { %1420 = vrot.lane.b32.xlu0 %v1418_v62, %s2057_s8 }
0x15d3   :  { %v1467_v63 = vpop.permute.xlu1 %1466 }
0x15d4   :  { %1929 = vmatmul.mubr.msk.bf16.vlgmr.msra.gmra.mxu1 %vm53_vm1, %v1467_v63 }
0x15d9   :  { %v1421_v3 = vpop.permute.xlu0 %1420 }
0x15da   :  { %1921 = vmatmul.mubr.msk.bf16.vlgmr.msra.gmra.mxu0 %vm53_vm1, %v1421_v3 }
0x15db   :  { %1940 = vmatprep.mubr.msk.f32.mxu0 %vm2054_vm0, %v2053_v0  ;;  %1933 = vmatpush3.msra.mxu0 %v1537_v27 }
0x15dc   :  { %1934 = vmatprep.subr.mxu0 %v2053_v0 }
0x15dd   :  { %1935 = vmatpush3.msra.mxu0 %v1536_v28 }
0x15de   :  { %1936 = vmatprep.subr.mxu0 %v2053_v0 }
0x15df   :  { %1937 = vmatpush3.msra.mxu0 %v1535_v29 }
0x15e0   :  { %1938 = vmatprep.subr.mxu0 %v2053_v0 }
0x15e1   :  { %1939 = vmatpush3.msra.mxu0 %v1534_v30 }
0x1694   :  { %v1505_v4 = vpop.f32.mrf.mxu1 }
0x1696   :  { %v1930_v5 = vpop.f32.mrf.mxu1 }
0x1698   :  { %v1508_v6 = vpop.f32.mrf.mxu1 }
0x169a   :  { %v1459_v7 = vpop.f32.mrf.mxu0  ;;  %v1931_v8 = vpop.f32.mrf.mxu1 }
0x169b   :  { %v1506_v9 = vadd.f32 %v1505_v4, %v1459_v7 }
0x169c   :  { %v1922_v10 = vpop.f32.mrf.mxu0 }
0x169d   :  { %v1511_v12 = vadd.f32 %v2052_v11, %v1506_v9 }
0x169e   :  { %v1462_v13 = vpop.f32.mrf.mxu0 }
0x169f   :  { %2044 = vtanh.f32 %v1511_v12  ;;  %v1512_v16 = vmul.f32 0.5, %v1511_v12 }
0x16a0   :  { %v1923_v14 = vpop.f32.mrf.mxu0 }
0x16a1   :  { %2046 = vtanh.f32 %v1512_v16 }
0x16ac   :  { %v2045_v15 = vpop.eup %2044 }
0x16ad   :  { %1519 = vrot.lane.b32.xlu0 %v2045_v15, %s2056_s30 }
0x16ae   :  { %v2047_v17 = vpop.eup %2046 }
0x16af   :  { %v1514_v18 = vmul.f32 0.5, %v2047_v17 }
0x16b1   :  { %v1515_v19 = vadd.f32 0.5, %v1514_v18 }
0x16b3   :  { %v1517_v24 = vmul.f32 %v1515_v19, %v1345_v51 }
0x171f   :  { %v1520_v20 = vpop.permute.xlu0 %1519 }
0x1720   :  { %v1522_v22 = vmul.f32 %v1520_v20, %v1515_v19 }
0x1722   :  { %1524 = vrot.lane.b32.xlu1 %v1522_v22, %s2057_s8 }
0x1794   :  { %v1525_v25 = vpop.permute.xlu1 %1524 }
0x1795   :  { %v1527_v26 = vadd.f32 %v1525_v25, %v1517_v24 }
0x1797   :  { %2048 = vtanh.f32 %v1527_v26 }
0x17a4   :  { %v2049_v31 = vpop.eup %2048 }
0x17a5   :  { %1530 = vrot.lane.b32.xlu0 %v2049_v31, %s2056_s30 }
0x1817   :  { %v1531_v32 = vpop.permute.xlu0 %1530 }
0x1818   :  { %v1533_v21 = vmul.f32 %v1531_v32, %v1515_v19 }
0x181a   :  { %1546 = vrot.lane.b32.xlu1 %v1533_v21, %s2057_s8 }
0x188c   :  { %v1547_v33 = vpop.permute.xlu1 %1546 }
0x188d   :  { %1941 = vmatmul.mubr.msk.f32.vlgmr.msra.gmra.mxu0 %vm53_vm1, %v1547_v33 }
0x194d   :  { %v1616_v1 = vpop.f32.mrf.mxu0 }
0x194e   :  { %v1617_v23 = vadd.f32 %v1661_v35, %v1616_v1 }
0x194f   :  { %v1942_v36 = vpop.f32.mrf.mxu0 }
0x1950   :  { %1620 = vst [vmem:[%s2485_s7] sm:$0xff] %v1617_v23 }

</bundles_post_ra>
